<compile_context>
chip_gen: v7x
topology: tpu7x:2x2x1
jax: 0.10.0
libtpu: 0.0.40
codegen_flags: <defaults>
</compile_context>

<pallas_src>
import numpy as np
import jax
import jax.numpy as jnp
from jax.experimental import pallas as pl
from jax.experimental.pallas import tpu as pltpu

HIDDEN = 128         # hidden_size (lane-aligned)
VOCAB = 64           # vocab_size
GATHER_CHUNK = 256   # S-chunk for the child gather (multiple of 16)


def _round_up(x, m):
    return (x + m - 1) // m * m


# ----------------------------------------------------------------------------
# Fused grid-over-levels kernel
# ----------------------------------------------------------------------------
def _make_kernel(max_m, n_chunks):
    H = HIDDEN
    CH = GATHER_CHUNK

    def kernel(noff_ref,                                   # scalar prefetch (SMEM)
               etab_ref, wioux_ref, wfx_ref, uiou_ref, uf_ref,
               h_ref, c_ref,                               # resident f32 outputs
               h_bf, c_bf, gh_acc, gc_acc):                # persistent VMEM scratch
        n = pl.program_id(0)
        max_e = etab_ref.shape[1]
        noff = pl.multiple_of(noff_ref[n], 16)

        # -- one-time init: zero the bf16 shadow state so rows that were never
        #    (or not yet) written contribute exact zeros to the gathers (no
        #    NaN propagation through the 0-weighted one-hot matmuls).
        @pl.when(n == 0)
        def _init():
            h_bf[...] = jnp.zeros_like(h_bf)
            c_bf[...] = jnp.zeros_like(c_bf)

        # -- this level's lane-dense edge table (padded slots hold -1 -> all
        #    zero one-hot columns; level 0 has only padded slots so the leaf
        #    equations fall out of the same code path).
        etab = etab_ref[...]                               # (8, E) int32
        cid = etab[0:1, :]                                 # (1, E) child positions
        ppos = etab[1:2, :]                                # (1, E) parent positions

        # -- chunked one-hot child gather against the bf16 shadow state.
        #    Children always live strictly below noff in the level-sorted
        #    layout, so chunks starting at or above noff are skipped.
        gh_acc[...] = jnp.zeros_like(gh_acc)
        gc_acc[...] = jnp.zeros_like(gc_acc)
        for ci in range(n_chunks):
            start = ci * CH

            @pl.when(start < noff)
            def _gather(start=start):
                s_iota = start + jax.lax.broadcasted_iota(
                    jnp.int32, (CH, max_e), 0)
                g = (s_iota == cid).astype(jnp.bfloat16)   # (CH, E) one-hot^T
                gh_acc[...] += jax.lax.dot_general(
                    g, h_bf[start:start + CH, :],
                    (((0,), (0,)), ((), ())),
                    preferred_element_type=jnp.float32)
                gc_acc[...] += jax.lax.dot_general(
                    g, c_bf[start:start + CH, :],
                    (((0,), (0,)), ((), ())),
                    preferred_element_type=jnp.float32)
        child_h = gh_acc[...]                              # (E, H) f32
        child_c = gc_acc[...]                              # (E, H) f32

        # -- single-orientation segment one-hot (M, E), bf16
        m_iota = noff + jax.lax.broadcasted_iota(jnp.int32, (max_m, max_e), 0)
        seg = (ppos == m_iota).astype(jnp.bfloat16)        # (M, E)

        # forget gates: f = sigmoid(seg^T @ W_f(x) + U_f(child_h))
        wfx_lvl = wfx_ref[pl.ds(noff, max_m), :]           # (M, H) bf16
        wfx_edge = jax.lax.dot_general(                    # (E, H) = seg^T @ wfx
            seg, wfx_lvl, (((0,), (0,)), ((), ())),
            preferred_element_type=jnp.float32)
        child_h_bf = child_h.astype(jnp.bfloat16)
        uf_ch = jnp.dot(child_h_bf, uf_ref[...],
                        preferred_element_type=jnp.float32)
        f = jax.nn.sigmoid(wfx_edge + uf_ch)
        fc_bf = (f * child_c).astype(jnp.bfloat16)

        # segment sums over children (one bf16 matmul each)
        h_sum = jnp.dot(seg, child_h_bf, preferred_element_type=jnp.float32)
        c_sum = jnp.dot(seg, fc_bf, preferred_element_type=jnp.float32)

        # fused i/o/u gates: one 3H-wide matmul, free 128-lane static slices
        iou = (wioux_ref[pl.ds(noff, max_m), :].astype(jnp.float32)
               + jnp.dot(h_sum.astype(jnp.bfloat16), uiou_ref[...],
                         preferred_element_type=jnp.float32))    # (M, 3H)
        i = jax.nn.sigmoid(iou[:, :H])
        o = jax.nn.sigmoid(iou[:, H:2 * H])
        u = jnp.tanh(iou[:, 2 * H:])

        c_new = i * u + c_sum
        h_new = o * jnp.tanh(c_new)

        # NOTE: this scatter writes max_m rows starting at noff, which may
        # spill into later levels' (not yet computed) regions.  That is safe
        # only because the level axis runs strictly sequentially
        # ("arbitrary") and each level fully rewrites its own region before
        # any later level reads it.  Never parallelize the level axis.
        h_ref[pl.ds(noff, max_m), :] = h_new
        c_ref[pl.ds(noff, max_m), :] = c_new
        h_bf[pl.ds(noff, max_m), :] = h_new.astype(jnp.bfloat16)
        c_bf[pl.ds(noff, max_m), :] = c_new.astype(jnp.bfloat16)

    return kernel


# ----------------------------------------------------------------------------
# Parameters (PyTorch-shaped init, kernel uses bf16 transposed views)
# ----------------------------------------------------------------------------
def init_params(key, vocab, hidden):
    ks = jax.random.split(key, 7)
    H = hidden
    bound = 1.0 / np.sqrt(H)
    emb = jax.random.normal(ks[0], (vocab, H), jnp.float32)
    W_iou = jax.random.uniform(ks[1], (3 * H, H), jnp.float32, -bound, bound)
    b_iou = jax.random.uniform(ks[2], (3 * H,), jnp.float32, -bound, bound)
    U_iou = jax.random.uniform(ks[3], (3 * H, H), jnp.float32, -bound, bound)
    W_f = jax.random.uniform(ks[4], (H, H), jnp.float32, -bound, bound)
    b_f = jax.random.uniform(ks[5], (H,), jnp.float32, -bound, bound)
    U_f = jax.random.uniform(ks[6], (H, H), jnp.float32, -bound, bound)
    return dict(
        emb_bf16=emb.astype(jnp.bfloat16),
        WiouT_bf16=W_iou.T.astype(jnp.bfloat16),   # (H, 3H) so x @ W
        UiouT_bf16=U_iou.T.astype(jnp.bfloat16),   # (H, 3H)
        WfT_bf16=W_f.T.astype(jnp.bfloat16),       # (H, H)
        UfT_bf16=U_f.T.astype(jnp.bfloat16),       # (H, H)
        b_iou=b_iou.reshape(1, 3 * H),             # biases f32 (post-MXU add)
        b_f=b_f.reshape(1, H),
    )


# ----------------------------------------------------------------------------
# Forward pass: host flattens the tree schedule once, one pallas_call runs it
# ----------------------------------------------------------------------------
def child_sum_tree_lstm_forward(params, features, node_order, adjacency_list,
                                edge_order):
    # TODO(synk): the data-dependent tree schedule (level bucketing and the
    # per-level index tables) is flattened once on the host with numpy; all
    # numeric work runs as two hoisted XLA matmuls + one fused pallas_call.
    node_order = np.asarray(node_order)
    edge_order = np.asarray(edge_order)
    adjacency_list = np.asarray(adjacency_list)
    feats = np.asarray(features)

    H = HIDDEN
    N = node_order.shape[0]
    L = int(node_order.max()) + 1

    # level-sorted node layout, each level padded to a multiple of 16 rows
    # (bf16 sublane alignment for the noff-based dynamic slices)
    pos_of_node = np.zeros(N, np.int32)
    noff = np.zeros(L, np.int32)
    sizes = []
    off = 0
    for lvl in range(L):
        ids = np.nonzero(node_order == lvl)[0]
        noff[lvl] = off
        pos_of_node[ids] = off + np.arange(ids.shape[0], dtype=np.int32)
        sizes.append(ids.shape[0])
        off += _round_up(max(ids.shape[0], 1), 16)
    max_m = max(_round_up(max(s, 1), 16) for s in sizes)
    spad = _round_up(int(noff[L - 1]) + max_m, GATHER_CHUNK)
    n_chunks = spad // GATHER_CHUNK

    # per-level lane-dense edge table: row 0 = child pos, row 1 = parent pos
    e_counts = [int(np.sum(edge_order == lvl)) for lvl in range(L)]
    max_e = _round_up(max(e_counts + [1]), 128)
    etab = np.full((L * 8, max_e), -1, np.int32)
    for lvl in range(1, L):
        eidx = np.nonzero(edge_order == lvl)[0]
        if eidx.size == 0:
            continue
        etab[8 * lvl, :eidx.size] = pos_of_node[adjacency_list[eidx, 1]]
        etab[8 * lvl + 1, :eidx.size] = pos_of_node[adjacency_list[eidx, 0]]

    feat_vec = np.zeros((spad,), np.int32)
    feat_vec[pos_of_node] = feats[:, 0]

    # level-independent projections hoisted out of the kernel (bf16 matmuls,
    # f32 accumulate + bias, stored bf16 so they stay small while resident)
    x_all = jnp.take(params["emb_bf16"], jnp.asarray(feat_vec), axis=0)
    wioux = (jnp.dot(x_all, params["WiouT_bf16"],
                     preferred_element_type=jnp.float32)
             + params["b_iou"]).astype(jnp.bfloat16)          # (spad, 3H)
    wfx = (jnp.dot(x_all, params["WfT_bf16"],
                   preferred_element_type=jnp.float32)
           + params["b_f"]).astype(jnp.bfloat16)              # (spad, H)
    uiou = params["UiouT_bf16"]
    uf = params["UfT_bf16"]

    const2 = lambda n, s: (0, 0)     # full-array block, resident in VMEM
    in_specs = [
        pl.BlockSpec((8, max_e), lambda n, s: (n, 0)),        # etab: per level
        pl.BlockSpec((spad, 3 * H), const2),                  # W_iou(x)+b
        pl.BlockSpec((spad, H), const2),                      # W_f(x)+b
        pl.BlockSpec((H, 3 * H), const2),                     # U_iou^T
        pl.BlockSpec((H, H), const2),                         # U_f^T
    ]
    out_specs = (pl.BlockSpec((spad, H), const2),
                 pl.BlockSpec((spad, H), const2))

    # explicit VMEM budget: resident state + weights + tables + temporaries,
    # doubled (pipeline buffers) plus headroom, capped below v7x physical VMEM
    state_b = 2 * spad * H * 4 + 2 * spad * H * 2 + 2 * max_e * H * 4
    weight_b = spad * 3 * H * 2 + spad * H * 2 + 4 * H * H * 2
    table_b = 2 * 8 * max_e * 4
    temp_b = ((GATHER_CHUNK + max_m) * max_e * 2
              + 6 * max_e * H * 4 + 8 * max_m * H * 4)
    vmem_limit = int(min(64 << 20,
                         2 * (state_b + weight_b + table_b + temp_b)
                         + (16 << 20)))

    flops = int(L * (4 * spad * max_e * H + 6 * max_m * max_e * H
                     + 2 * max_e * H * H + 6 * max_m * H * H))
    transcend = int(L * (max_e * H + 4 * max_m * H))
    bytes_acc = int(weight_b + L * 8 * max_e * 4 + 2 * spad * H * 4)

    fwd = pl.pallas_call(
        _make_kernel(max_m, n_chunks),
        out_shape=(jax.ShapeDtypeStruct((spad, H), jnp.float32),
                   jax.ShapeDtypeStruct((spad, H), jnp.float32)),
        grid_spec=pltpu.PrefetchScalarGridSpec(
            num_scalar_prefetch=1,
            grid=(L,),
            in_specs=in_specs,
            out_specs=out_specs,
            scratch_shapes=[pltpu.VMEM((spad, H), jnp.bfloat16),   # h shadow
                            pltpu.VMEM((spad, H), jnp.bfloat16),   # c shadow
                            pltpu.VMEM((max_e, H), jnp.float32),   # child_h acc
                            pltpu.VMEM((max_e, H), jnp.float32)]), # child_c acc
        # TODO(synk): on v7x, shard independent trees of the forest across the
        # two TensorCores via a leading "parallel" grid axis; the level axis
        # itself must stay "arbitrary" (strictly sequential).
        compiler_params=pltpu.CompilerParams(
            dimension_semantics=("arbitrary",),
            vmem_limit_bytes=vmem_limit),
        cost_estimate=pl.CostEstimate(flops=flops, transcendentals=transcend,
                                      bytes_accessed=bytes_acc),
    )
    h_sorted, c_sorted = fwd(jnp.asarray(noff), jnp.asarray(etab),
                             wioux, wfx, uiou, uf)

    unsort = jnp.asarray(pos_of_node)          # back to original node order
    return h_sorted[unsort], c_sorted[unsort]


# ----------------------------------------------------------------------------
# Pure-numpy reference (PyTorch math, using the same bf16-rounded weights)
# ----------------------------------------------------------------------------
def _sig(x):
    return 1.0 / (1.0 + np.exp(-x))


def reference_forward(params, features, node_order, adjacency_list, edge_order):
    H = HIDDEN
    to_f32 = lambda a: np.asarray(jnp.asarray(a).astype(jnp.float32))
    emb = to_f32(params["emb_bf16"])
    WiouT = to_f32(params["WiouT_bf16"])
    UiouT = to_f32(params["UiouT_bf16"])
    WfT = to_f32(params["WfT_bf16"])
    UfT = to_f32(params["UfT_bf16"])
    biou = np.asarray(params["b_iou"])
    bfb = np.asarray(params["b_f"])

    node_order = np.asarray(node_order)
    edge_order = np.asarray(edge_order)
    adjacency_list = np.asarray(adjacency_list)
    feats = np.asarray(features)

    N = node_order.shape[0]
    h = np.zeros((N, H), np.float32)
    c = np.zeros((N, H), np.float32)
    for n in range(int(node_order.max()) + 1):
        nidx = np.nonzero(node_order == n)[0]
        ex = emb[feats[nidx, 0]]
        if n == 0:
            iou = ex @ WiouT + biou
        else:
            eidx = np.nonzero(edge_order == n)[0]
            edges = adjacency_list[eidx]
            par, chi = edges[:, 0], edges[:, 1]
            child_h, child_c = h[chi], c[chi]
            seg = (par[None, :] == nidx[:, None]).astype(np.float32)
            h_sum = seg @ child_h
            iou = ex @ WiouT + biou + h_sum @ UiouT
        i = _sig(iou[:, :H])
        o = _sig(iou[:, H:2 * H])
        u = np.tanh(iou[:, 2 * H:])
        if n == 0:
            c[nidx] = i * u
        else:
            pe = emb[feats[par, 0]]
            f = _sig(pe @ WfT + bfb + child_h @ UfT)
            fc = f * child_c
            c_sum = seg @ fc
            c[nidx] = i * u + c_sum
        h[nidx] = o * np.tanh(c[nidx])
    return h, c


# ----------------------------------------------------------------------------
if __name__ == "__main__":
    key = jax.random.PRNGKey(0)
    pkey, fkey = jax.random.split(key)
    params = init_params(pkey, VOCAB, HIDDEN)

    # Two trees batched together (10 nodes, 8 edges):
    #   tree A: 0 -> (1, 2), 1 -> (3, 4), 2 -> (5, 6)
    #   tree B: 7 -> (8, 9)
    node_order = np.array([2, 1, 1, 0, 0, 0, 0, 1, 0, 0], dtype=np.int32)
    adjacency_list = np.array(
        [[0, 1], [0, 2], [1, 3], [1, 4], [2, 5], [2, 6], [7, 8], [7, 9]],
        dtype=np.int32)
    edge_order = np.array([2, 2, 1, 1, 1, 1, 1, 1], dtype=np.int32)
    features = jax.random.randint(fkey, (10, 1), 0, VOCAB, dtype=jnp.int32)

    h, c = child_sum_tree_lstm_forward(params, features, node_order,
                                       adjacency_list, edge_order)
    h = jax.block_until_ready(h)
    c = jax.block_until_ready(c)

    h_ref, c_ref = reference_forward(params, features, node_order,
                                     adjacency_list, edge_order)
    # bf16 matmul operands + bf16-resident projections/state shadows
    # (f32 accumulation everywhere) -> loosened tolerance
    np.testing.assert_allclose(np.asarray(h), h_ref, rtol=2e-2, atol=2e-2)
    np.testing.assert_allclose(np.asarray(c), c_ref, rtol=2e-2, atol=2e-2)
    print("KERNEL_OK")
</pallas_src>

<mosaic_0001>
module attributes {stable_mosaic.version = 11 : i64} {
  func.func @kernel(%arg0: i32, %arg1: memref<3xi32, #tpu.memory_space<smem>>, %arg2: memref<8x128xi32, #tpu.memory_space<vmem>>, %arg3: memref<256x384xbf16, #tpu.memory_space<vmem>>, %arg4: memref<256x128xbf16, #tpu.memory_space<vmem>>, %arg5: memref<128x384xbf16, #tpu.memory_space<vmem>>, %arg6: memref<128x128xbf16, #tpu.memory_space<vmem>>, %arg7: memref<256x128xf32, #tpu.memory_space<vmem>>, %arg8: memref<256x128xf32, #tpu.memory_space<vmem>>, %arg9: memref<256x128xbf16, #tpu.memory_space<vmem>>, %arg10: memref<256x128xbf16, #tpu.memory_space<vmem>>, %arg11: memref<128x128xf32, #tpu.memory_space<vmem>>, %arg12: memref<128x128xf32, #tpu.memory_space<vmem>>) attributes {dimension_semantics = [#tpu.dimension_semantics<arbitrary>], iteration_bounds = array<i64: 3>, scalar_prefetch = 1 : i64, scratch_operands = 4 : i64, tpu.core_type = #tpu.core_type<tc>, window_params = [{transform_indices = @transform_0, window_bounds = array<i64: 8, 128>}, {pipeline_mode = #tpu.pipeline_mode<synchronous>, transform_indices = @transform_1, window_bounds = array<i64: 256, 384>}, {pipeline_mode = #tpu.pipeline_mode<synchronous>, transform_indices = @transform_2, window_bounds = array<i64: 256, 128>}, {pipeline_mode = #tpu.pipeline_mode<synchronous>, transform_indices = @transform_3, window_bounds = array<i64: 128, 384>}, {pipeline_mode = #tpu.pipeline_mode<synchronous>, transform_indices = @transform_4, window_bounds = array<i64: 128, 128>}, {pipeline_mode = #tpu.pipeline_mode<synchronous>, transform_indices = @transform_5, window_bounds = array<i64: 256, 128>}, {pipeline_mode = #tpu.pipeline_mode<synchronous>, transform_indices = @transform_6, window_bounds = array<i64: 256, 128>}]} {
    %0 = arith.index_cast %arg0 : i32 to index
    %1 = memref.load %arg1[%0] : memref<3xi32, #tpu.memory_space<smem>>
    %2 = tpu.assume_multiple %1, 16 : i32
    %c0_i32 = arith.constant 0 : i32
    %3 = arith.cmpi eq, %arg0, %c0_i32 : i32
    %4 = arith.extui %3 : i1 to i32
    %c0_i32_0 = arith.constant 0 : i32
    %5 = arith.cmpi ne, %4, %c0_i32_0 : i32
    scf.if %5 {
      %cst_31 = arith.constant 0.000000e+00 : bf16
      %77 = vector.broadcast %cst_31 : bf16 to vector<256x128xbf16>
      %c0_32 = arith.constant 0 : index
      %c0_33 = arith.constant 0 : index
      %78 = vector.load %arg9[%c0_32, %c0_33] : memref<256x128xbf16, #tpu.memory_space<vmem>>, vector<256x128xbf16>
      tpu.vector_store %arg9[%c0_32, %c0_33], %77 {strides = array<i32>} : memref<256x128xbf16, #tpu.memory_space<vmem>>, vector<256x128xbf16>,
      %cst_34 = arith.constant 0.000000e+00 : bf16
      %79 = vector.broadcast %cst_34 : bf16 to vector<256x128xbf16>
      %c0_35 = arith.constant 0 : index
      %c0_36 = arith.constant 0 : index
      %80 = vector.load %arg10[%c0_35, %c0_36] : memref<256x128xbf16, #tpu.memory_space<vmem>>, vector<256x128xbf16>
      tpu.vector_store %arg10[%c0_35, %c0_36], %79 {strides = array<i32>} : memref<256x128xbf16, #tpu.memory_space<vmem>>, vector<256x128xbf16>,
    } else {
    }
    %c0 = arith.constant 0 : index
    %c0_1 = arith.constant 0 : index
    %6 = vector.load %arg2[%c0, %c0_1] : memref<8x128xi32, #tpu.memory_space<vmem>>, vector<8x128xi32>
    %7 = vector.extract_strided_slice %6 {offsets = [0, 0], sizes = [1, 128], strides = [1, 1]} : vector<8x128xi32> to vector<1x128xi32>
    %8 = vector.extract_strided_slice %6 {offsets = [1, 0], sizes = [1, 128], strides = [1, 1]} : vector<8x128xi32> to vector<1x128xi32>
    %cst = arith.constant 0.000000e+00 : f32
    %9 = vector.broadcast %cst : f32 to vector<128x128xf32>
    %c0_2 = arith.constant 0 : index
    %c0_3 = arith.constant 0 : index
    %10 = vector.load %arg11[%c0_2, %c0_3] : memref<128x128xf32, #tpu.memory_space<vmem>>, vector<128x128xf32>
    tpu.vector_store %arg11[%c0_2, %c0_3], %9 {strides = array<i32>} : memref<128x128xf32, #tpu.memory_space<vmem>>, vector<128x128xf32>,
    %cst_4 = arith.constant 0.000000e+00 : f32
    %11 = vector.broadcast %cst_4 : f32 to vector<128x128xf32>
    %c0_5 = arith.constant 0 : index
    %c0_6 = arith.constant 0 : index
    %12 = vector.load %arg12[%c0_5, %c0_6] : memref<128x128xf32, #tpu.memory_space<vmem>>, vector<128x128xf32>
    tpu.vector_store %arg12[%c0_5, %c0_6], %11 {strides = array<i32>} : memref<128x128xf32, #tpu.memory_space<vmem>>, vector<128x128xf32>,
    %c0_i32_7 = arith.constant 0 : i32
    %13 = arith.cmpi sgt, %2, %c0_i32_7 : i32
    %14 = arith.extui %13 : i1 to i32
    %c0_i32_8 = arith.constant 0 : i32
    %15 = arith.cmpi ne, %14, %c0_i32_8 : i32
    scf.if %15 {
      %77 = tpu.iota {dimensions = array<i32: 0>} : vector<256x128xi32>
      %c0_i32_31 = arith.constant 0 : i32
      %78 = vector.broadcast %c0_i32_31 : i32 to vector<256x128xi32>
      %79 = arith.addi %78, %77 : vector<256x128xi32>
      %80 = vector.broadcast %7 : vector<1x128xi32> to vector<256x128xi32>
      %81 = arith.cmpi eq, %79, %80 : vector<256x128xi32>
      %82 = arith.extui %81 : vector<256x128xi1> to vector<256x128xi32>
      %83 = arith.sitofp %82 : vector<256x128xi32> to vector<256x128xf32>
      %84 = arith.truncf %83 : vector<256x128xf32> to vector<256x128xbf16>
      %c0_32 = arith.constant 0 : index
      %c0_33 = arith.constant 0 : index
      %85 = vector.load %arg11[%c0_32, %c0_33] : memref<128x128xf32, #tpu.memory_space<vmem>>, vector<128x128xf32>
      %c0_34 = arith.constant 0 : index
      %c0_35 = arith.constant 0 : index
      %86 = vector.load %arg9[%c0_34, %c0_35] : memref<256x128xbf16, #tpu.memory_space<vmem>>, vector<256x128xbf16>
      %cst_36 = arith.constant dense<0.000000e+00> : vector<128x128xf32>
      %87 = tpu.matmul %84, %86, %cst_36 {dimension_numbers = #tpu.dot_dimension_numbers<[0], [0], [1], [1], [0, 1, 1, 1], [], []>} : vector<256x128xbf16>, vector<256x128xbf16>, vector<128x128xf32> -> vector<128x128xf32>
      %88 = arith.addf %85, %87 : vector<128x128xf32>
      %c0_37 = arith.constant 0 : index
      %c0_38 = arith.constant 0 : index
      %89 = vector.load %arg11[%c0_37, %c0_38] : memref<128x128xf32, #tpu.memory_space<vmem>>, vector<128x128xf32>
      tpu.vector_store %arg11[%c0_37, %c0_38], %88 {strides = array<i32>} : memref<128x128xf32, #tpu.memory_space<vmem>>, vector<128x128xf32>,
      %c0_39 = arith.constant 0 : index
      %c0_40 = arith.constant 0 : index
      %90 = vector.load %arg12[%c0_39, %c0_40] : memref<128x128xf32, #tpu.memory_space<vmem>>, vector<128x128xf32>
      %c0_41 = arith.constant 0 : index
      %c0_42 = arith.constant 0 : index
      %91 = vector.load %arg10[%c0_41, %c0_42] : memref<256x128xbf16, #tpu.memory_space<vmem>>, vector<256x128xbf16>
      %cst_43 = arith.constant dense<0.000000e+00> : vector<128x128xf32>
      %92 = tpu.matmul %84, %91, %cst_43 {dimension_numbers = #tpu.dot_dimension_numbers<[0], [0], [1], [1], [0, 1, 1, 1], [], []>} : vector<256x128xbf16>, vector<256x128xbf16>, vector<128x128xf32> -> vector<128x128xf32>
      %93 = arith.addf %90, %92 : vector<128x128xf32>
      %c0_44 = arith.constant 0 : index
      %c0_45 = arith.constant 0 : index
      %94 = vector.load %arg12[%c0_44, %c0_45] : memref<128x128xf32, #tpu.memory_space<vmem>>, vector<128x128xf32>
      tpu.vector_store %arg12[%c0_44, %c0_45], %93 {strides = array<i32>} : memref<128x128xf32, #tpu.memory_space<vmem>>, vector<128x128xf32>,
    } else {
    }
    %c0_9 = arith.constant 0 : index
    %c0_10 = arith.constant 0 : index
    %16 = vector.load %arg11[%c0_9, %c0_10] : memref<128x128xf32, #tpu.memory_space<vmem>>, vector<128x128xf32>
    %c0_11 = arith.constant 0 : index
    %c0_12 = arith.constant 0 : index
    %17 = vector.load %arg12[%c0_11, %c0_12] : memref<128x128xf32, #tpu.memory_space<vmem>>, vector<128x128xf32>
    %18 = tpu.iota {dimensions = array<i32: 0>} : vector<16x128xi32>
    %19 = vector.broadcast %2 : i32 to vector<16x128xi32>
    %20 = arith.addi %19, %18 : vector<16x128xi32>
    %21 = vector.broadcast %8 : vector<1x128xi32> to vector<16x128xi32>
    %22 = arith.cmpi eq, %21, %20 : vector<16x128xi32>
    %23 = arith.extui %22 : vector<16x128xi1> to vector<16x128xi32>
    %24 = arith.sitofp %23 : vector<16x128xi32> to vector<16x128xf32>
    %25 = arith.truncf %24 : vector<16x128xf32> to vector<16x128xbf16>
    %26 = arith.index_cast %2 : i32 to index
    %c0_13 = arith.constant 0 : index
    %27 = vector.load %arg4[%26, %c0_13] : memref<256x128xbf16, #tpu.memory_space<vmem>>, vector<16x128xbf16>
    %cst_14 = arith.constant dense<0.000000e+00> : vector<128x128xf32>
    %28 = tpu.matmul %25, %27, %cst_14 {dimension_numbers = #tpu.dot_dimension_numbers<[0], [0], [1], [1], [0, 1, 1, 1], [], []>} : vector<16x128xbf16>, vector<16x128xbf16>, vector<128x128xf32> -> vector<128x128xf32>
    %29 = arith.truncf %16 : vector<128x128xf32> to vector<128x128xbf16>
    %c0_15 = arith.constant 0 : index
    %c0_16 = arith.constant 0 : index
    %30 = vector.load %arg6[%c0_15, %c0_16] : memref<128x128xbf16, #tpu.memory_space<vmem>>, vector<128x128xbf16>
    %cst_17 = arith.constant dense<0.000000e+00> : vector<128x128xf32>
    %31 = tpu.matmul %29, %30, %cst_17 {dimension_numbers = #tpu.dot_dimension_numbers<[1], [0], [0], [1], [0, 0, 1, 1], [], []>} : vector<128x128xbf16>, vector<128x128xbf16>, vector<128x128xf32> -> vector<128x128xf32>
    %32 = arith.addf %28, %31 : vector<128x128xf32>
    %33 = arith.negf %32 : vector<128x128xf32>
    %34 = math.exp %33 : vector<128x128xf32>
    %cst_18 = arith.constant 1.000000e+00 : f32
    %35 = vector.broadcast %cst_18 : f32 to vector<128x128xf32>
    %36 = arith.addf %35, %34 : vector<128x128xf32>
    %37 = arith.divf %35, %36 : vector<128x128xf32>
    %38 = arith.mulf %37, %17 : vector<128x128xf32>
    %39 = arith.truncf %38 : vector<128x128xf32> to vector<128x128xbf16>
    %cst_19 = arith.constant dense<0.000000e+00> : vector<16x128xf32>
    %40 = tpu.matmul %25, %29, %cst_19 {dimension_numbers = #tpu.dot_dimension_numbers<[1], [0], [0], [1], [0, 0, 1, 1], [], []>} : vector<16x128xbf16>, vector<128x128xbf16>, vector<16x128xf32> -> vector<16x128xf32>
    %cst_20 = arith.constant dense<0.000000e+00> : vector<16x128xf32>
    %41 = tpu.matmul %25, %39, %cst_20 {dimension_numbers = #tpu.dot_dimension_numbers<[1], [0], [0], [1], [0, 0, 1, 1], [], []>} : vector<16x128xbf16>, vector<128x128xbf16>, vector<16x128xf32> -> vector<16x128xf32>
    %42 = arith.index_cast %2 : i32 to index
    %c0_21 = arith.constant 0 : index
    %43 = vector.load %arg3[%42, %c0_21] : memref<256x384xbf16, #tpu.memory_space<vmem>>, vector<16x384xbf16>
    %44 = arith.extf %43 : vector<16x384xbf16> to vector<16x384xf32>
    %45 = arith.truncf %40 : vector<16x128xf32> to vector<16x128xbf16>
    %c0_22 = arith.constant 0 : index
    %c0_23 = arith.constant 0 : index
    %46 = vector.load %arg5[%c0_22, %c0_23] : memref<128x384xbf16, #tpu.memory_space<vmem>>, vector<128x384xbf16>
    %cst_24 = arith.constant dense<0.000000e+00> : vector<16x384xf32>
    %47 = tpu.matmul %45, %46, %cst_24 {dimension_numbers = #tpu.dot_dimension_numbers<[1], [0], [0], [1], [0, 0, 1, 1], [], []>} : vector<16x128xbf16>, vector<128x384xbf16>, vector<16x384xf32> -> vector<16x384xf32>
    %48 = arith.addf %44, %47 : vector<16x384xf32>
    %49 = vector.extract_strided_slice %48 {offsets = [0, 0], sizes = [16, 128], strides = [1, 1]} : vector<16x384xf32> to vector<16x128xf32>
    %50 = arith.negf %49 : vector<16x128xf32>
    %51 = math.exp %50 : vector<16x128xf32>
    %cst_25 = arith.constant 1.000000e+00 : f32
    %52 = vector.broadcast %cst_25 : f32 to vector<16x128xf32>
    %53 = arith.addf %52, %51 : vector<16x128xf32>
    %54 = arith.divf %52, %53 : vector<16x128xf32>
    %55 = vector.extract_strided_slice %48 {offsets = [0, 128], sizes = [16, 128], strides = [1, 1]} : vector<16x384xf32> to vector<16x128xf32>
    %56 = arith.negf %55 : vector<16x128xf32>
    %57 = math.exp %56 : vector<16x128xf32>
    %cst_26 = arith.constant 1.000000e+00 : f32
    %58 = vector.broadcast %cst_26 : f32 to vector<16x128xf32>
    %59 = arith.addf %58, %57 : vector<16x128xf32>
    %60 = arith.divf %58, %59 : vector<16x128xf32>
    %61 = vector.extract_strided_slice %48 {offsets = [0, 256], sizes = [16, 128], strides = [1, 1]} : vector<16x384xf32> to vector<16x128xf32>
    %62 = math.tanh %61 : vector<16x128xf32>
    %63 = arith.mulf %54, %62 : vector<16x128xf32>
    %64 = arith.addf %63, %41 : vector<16x128xf32>
    %65 = math.tanh %64 : vector<16x128xf32>
    %66 = arith.mulf %60, %65 : vector<16x128xf32>
    %67 = arith.index_cast %2 : i32 to index
    %c0_27 = arith.constant 0 : index
    %68 = vector.load %arg7[%67, %c0_27] : memref<256x128xf32, #tpu.memory_space<vmem>>, vector<16x128xf32>
    tpu.vector_store %arg7[%67, %c0_27], %66 {strides = array<i32>} : memref<256x128xf32, #tpu.memory_space<vmem>>, vector<16x128xf32>,
    %69 = arith.index_cast %2 : i32 to index
    %c0_28 = arith.constant 0 : index
    %70 = vector.load %arg8[%69, %c0_28] : memref<256x128xf32, #tpu.memory_space<vmem>>, vector<16x128xf32>
    tpu.vector_store %arg8[%69, %c0_28], %64 {strides = array<i32>} : memref<256x128xf32, #tpu.memory_space<vmem>>, vector<16x128xf32>,
    %71 = arith.truncf %66 : vector<16x128xf32> to vector<16x128xbf16>
    %72 = arith.index_cast %2 : i32 to index
    %c0_29 = arith.constant 0 : index
    %73 = vector.load %arg9[%72, %c0_29] : memref<256x128xbf16, #tpu.memory_space<vmem>>, vector<16x128xbf16>
    tpu.vector_store %arg9[%72, %c0_29], %71 {strides = array<i32>} : memref<256x128xbf16, #tpu.memory_space<vmem>>, vector<16x128xbf16>,
    %74 = arith.truncf %64 : vector<16x128xf32> to vector<16x128xbf16>
    %75 = arith.index_cast %2 : i32 to index
    %c0_30 = arith.constant 0 : index
    %76 = vector.load %arg10[%75, %c0_30] : memref<256x128xbf16, #tpu.memory_space<vmem>>, vector<16x128xbf16>
    tpu.vector_store %arg10[%75, %c0_30], %74 {strides = array<i32>} : memref<256x128xbf16, #tpu.memory_space<vmem>>, vector<16x128xbf16>,
    return
  }
  func.func @transform_0(%arg0: i32, %arg1: memref<3xi32, #tpu.memory_space<smem>>) -> (i32, i32) {
    %c0_i32 = arith.constant 0 : i32
    %c0_i32_0 = arith.constant 0 : i32
    return %arg0, %c0_i32 : i32, i32
  }
  func.func @transform_1(%arg0: i32, %arg1: memref<3xi32, #tpu.memory_space<smem>>) -> (i32, i32) {
    %c0_i32 = arith.constant 0 : i32
    %c0_i32_0 = arith.constant 0 : i32
    %c0_i32_1 = arith.constant 0 : i32
    return %c0_i32, %c0_i32_0 : i32, i32
  }
  func.func @transform_2(%arg0: i32, %arg1: memref<3xi32, #tpu.memory_space<smem>>) -> (i32, i32) {
    %c0_i32 = arith.constant 0 : i32
    %c0_i32_0 = arith.constant 0 : i32
    %c0_i32_1 = arith.constant 0 : i32
    return %c0_i32, %c0_i32_0 : i32, i32
  }
  func.func @transform_3(%arg0: i32, %arg1: memref<3xi32, #tpu.memory_space<smem>>) -> (i32, i32) {
    %c0_i32 = arith.constant 0 : i32
    %c0_i32_0 = arith.constant 0 : i32
    %c0_i32_1 = arith.constant 0 : i32
    return %c0_i32, %c0_i32_0 : i32, i32
  }
  func.func @transform_4(%arg0: i32, %arg1: memref<3xi32, #tpu.memory_space<smem>>) -> (i32, i32) {
    %c0_i32 = arith.constant 0 : i32
    %c0_i32_0 = arith.constant 0 : i32
    %c0_i32_1 = arith.constant 0 : i32
    return %c0_i32, %c0_i32_0 : i32, i32
  }
  func.func @transform_5(%arg0: i32, %arg1: memref<3xi32, #tpu.memory_space<smem>>) -> (i32, i32) {
    %c0_i32 = arith.constant 0 : i32
    %c0_i32_0 = arith.constant 0 : i32
    %c0_i32_1 = arith.constant 0 : i32
    return %c0_i32, %c0_i32_0 : i32, i32
  }
  func.func @transform_6(%arg0: i32, %arg1: memref<3xi32, #tpu.memory_space<smem>>) -> (i32, i32) {
    %c0_i32 = arith.constant 0 : i32
    %c0_i32_0 = arith.constant 0 : i32
    %c0_i32_1 = arith.constant 0 : i32
    return %c0_i32, %c0_i32_0 : i32, i32
  }
}

</mosaic_0001>

<bundles_post_ra>
// kernel: tpu_custom_call.1
= control target key start
LH: loop header
LB: loop body
LE: loop exit
PB: predicated region body
PF: predicated region fallthrough
CT: control target
= control target key end

     0   :  { %s3432_s0 = inlined_call_operand.hbm [shape: s32[3], index: 0, kind: input, shape index: {}]   ;;  %s3433_s1 = inlined_call_operand.hbm [shape: s32[24,128], index: 1, kind: input, shape index: {}]   ;;  %s3434_s2 = inlined_call_operand.hbm [shape: bf16[256,384], index: 2, kind: input, shape index: {}]   ;;  %s3435_s3 = inlined_call_operand.hbm [shape: bf16[256,128], index: 3, kind: input, shape index: {}]   ;;  %s3436_s4 = inlined_call_operand.hbm [shape: bf16[128,384], index: 4, kind: input, shape index: {}]   ;;  %s3437_s5 = inlined_call_operand.hbm [shape: bf16[128,128], index: 5, kind: input, shape index: {}]   ;;  %s3438_s6 = inlined_call_operand.hbm [shape: f32[256,128], index: 6, kind: output, shape index: {0}]   ;;  %s3439_s7 = inlined_call_operand.hbm [shape: f32[256,128], index: 7, kind: output, shape index: {1}]  }
   0x1   :  { %s2579_s26 = scalar_lea.hbm %s3432_s0, 16 }
   0x2   :  { %p2580_p0 = scmp.ne.s32.totalorder %s3432_s0, %s2579_s26  ;;  %p2583_p1 = scmp.lt.u32.totalorder %s2579_s26, %s3432_s0 }
   0x4   :  { %p2585_p2 = pnand %p2583_p1, %p2580_p0 }
   0x6   :  { %2588 = shalt.err (!%p2585_p2)  }
   0x7   :  { %s2837_s8 = smov [#allocation7]  }
   0x8   :  { %14 = dma.hbm_to_smem %s3432_s0, 16, %s2837_s8, [#allocation6] }
   0x9   :  { %2799 = dma.done.wait [#allocation6], 16 }
   0xa   :  { %2800 = vsyncadd [#allocation6], 4294967280 }
   0xb   :  { %16 = sfence }
   0xc   :  { %17 = vsyncpa [#allocation9], 0 }
   0xd   :  { %19 = vsyncpa [#allocation9 + $0x1], 0 }
   0xe   :  { %20 = vsyncpa [#allocation12], 0 }
   0xf   :  { %21 = vsyncpa [#allocation15], 0 }
  0x10   :  { %22 = vsyncpa [#allocation10], 0 }
  0x11   :  { %23 = vsyncpa [#allocation19], 0  ;;  %s2909_s11 = smov 0   ;;  %s2911_s12 = smov 0  }
  0x12   :  { %s2913_s13 = smov 0   ;;  %s2915_s14 = smov 0  }
  0x13 LB: > { %s2838_s0 = smov [#allocation11]   ;;  %s2930_s16 = sadd.s32 4294967295, %s2835_s14   ;;  %s2835_s14 = sphi %s2915_s14, %s3459_s14   ;;  %s2831_s13 = sphi %s2913_s13, %s3458_s13   ;;  %s2827_s12 = sphi %s2911_s12, %s3457_s12   ;;  %s2823_s11 = sphi %s2909_s11, %s3456_s11  }
  0x14   : > { %s198_s15 = sshll.u32 %s2838_s0, 4  ;;  %p1911_p3 = scmp.ge.s32.totalorder %s2835_s14, 1  ;;  %s2936_s15 = int_to_ptr.vmem [resolvable:$true] %s198_s15 }
  0x15   : > { %p3440_p4 = scmp.eq.s32.totalorder %s2930_s16, 0  ;;  %p186_p5 = scmp.lt.s32.totalorder %s2835_s14, 4 }
  0x16   : > { %s2839_s18 = smov [#allocation14]   ;;  %s2840_s21 = smov [#allocation13]  }
  0x17   : > { %p2938_p7 = pnand %p1911_p3, %p186_p5  ;;  %s224_s19 = sshll.u32 %s2839_s18, 4  ;;  %s2950_s19 = int_to_ptr.vmem [resolvable:$true] %s224_s19 }
  0x18   : > { %s211_s22 = sshll.u32 %s2840_s21, 4  ;;  %s2589_s25 = scalar_lea.hbm %s3434_s2, 6144  ;;  %s2952_s22 = int_to_ptr.vmem [resolvable:$true] %s211_s22 }
  0x19   : > { %s3442_s17 = scalar_select %p2938_p7, 1, 0 }
  0x1a   : > { %p2369_p8 = pneg %p2938_p7  ;;  %p2590_p10 = scmp.ne.s32.totalorder %s3434_s2, %s2589_s25 }
  0x1b   : > { %p2596_p0 = scmp.lt.u32.totalorder %s2589_s25, %s3434_s2 }
  0x1c   : > { %p2946_p9 = pnand %p2369_p8, %p3440_p4 }
  0x1e   : > { %p2962_p11 = pneg %p2946_p9 }
  0x20   : > { %p2592_p12 = pnand %p2962_p11, %p2590_p10 }
  0x22   : > { %p2593_p13 = pneg %p2592_p12 }
  0x24   : > { %p2598_p1 = pnand %p2596_p0, %p2593_p13 }
  0x26   : > { %2601 = shalt.err (!%p2598_p1)
}
  0x27   : > { %s2602_s8 = scalar_lea.vmem %s2936_s15, 6144  ;;  %p2610_p8 = scmp.lt.s32.totalorder %s2936_s15, %s2936_s15 }
  0x28   : > { %p2603_p2 = scmp.ne.s32.totalorder %s2936_s15, %s2602_s8  ;;  %p2611_p6 = scmp.lt.s32.totalorder %s2602_s8, %s2602_s8 }
  0x2a   : > { %p2605_p3 = pnand %p2603_p2, %p2962_p11  ;;  %p2612_p10 = por %p2611_p6, %p2610_p8 }
  0x2c   : > { %p2606_p5 = pneg %p2605_p3 }
  0x2e   : > { %p2613_p12 = pnand %p2612_p10, %p2606_p5 }
  0x30   : > { %2616 = shalt.err (!%p2613_p12)
}
  0x31   : > { %s2841_s9 = smov 192   ;;  %s2842_s10 = smov 12  }
  0x32   : > { %2372 = dma.hbm_to_vmem [thread:$0]  (!%p2946_p9), %s3434_s2, 6144, %s2936_s15, [#allocation12], %s2841_s9, %s2841_s9, %s2842_s10  }
  0x33   : > { %s2617_s24 = scalar_lea.hbm %s3436_s4, 3072 }
  0x34   : > { %p2618_p6 = scmp.ne.s32.totalorder %s3436_s4, %s2617_s24  ;;  %p2624_p1 = scmp.lt.u32.totalorder %s2617_s24, %s3436_s4 }
  0x36   : > { %p2620_p13 = pnand %p2618_p6, %p2962_p11 }
  0x38   : > { %p2621_p0 = pneg %p2620_p13 }
  0x3a   : > { %p2626_p2 = pnand %p2624_p1, %p2621_p0 }
  0x3c   : > { %2629 = shalt.err (!%p2626_p2)
}
  0x3d   : > { %s2630_s15 = scalar_lea.vmem %s2950_s19, 3072  ;;  %p2638_p10 = scmp.lt.s32.totalorder %s2950_s19, %s2950_s19 }
  0x3e   : > { %p2631_p3 = scmp.ne.s32.totalorder %s2950_s19, %s2630_s15  ;;  %p2639_p12 = scmp.lt.s32.totalorder %s2630_s15, %s2630_s15 }
  0x40   : > { %p2633_p5 = pnand %p2631_p3, %p2962_p11  ;;  %p2640_p6 = por %p2639_p12, %p2638_p10 }
  0x42   : > { %p2634_p8 = pneg %p2633_p5 }
  0x44   : > { %p2641_p13 = pnand %p2640_p6, %p2634_p8 }
  0x46   : > { %2644 = shalt.err (!%p2641_p13)
}
  0x47   : > { %2378 = dma.hbm_to_vmem [thread:$0]  (!%p2946_p9), %s3436_s4, 3072, %s2950_s19, [#allocation15], %s2841_s9, %s2841_s9, %s2842_s10  }
  0x48   : > { %s2645_s21 = scalar_lea.hbm %s3435_s3, 2048 }
  0x49   : > { %p2646_p0 = scmp.ne.s32.totalorder %s3435_s3, %s2645_s21  ;;  %p2652_p3 = scmp.lt.u32.totalorder %s2645_s21, %s3435_s3 }
  0x4b   : > { %p2648_p1 = pnand %p2646_p0, %p2962_p11 }
  0x4d   : > { %p2649_p2 = pneg %p2648_p1 }
  0x4f   : > { %p2654_p5 = pnand %p2652_p3, %p2649_p2 }
  0x51   : > { %2657 = shalt.err (!%p2654_p5)
}
  0x52   : > { %s2658_s19 = scalar_lea.vmem %s2952_s22, 2048  ;;  %p2666_p6 = scmp.lt.s32.totalorder %s2952_s22, %s2952_s22 }
  0x53   : > { %p2659_p8 = scmp.ne.s32.totalorder %s2952_s22, %s2658_s19  ;;  %p2667_p13 = scmp.lt.s32.totalorder %s2658_s19, %s2658_s19 }
  0x55   : > { %p2661_p10 = pnand %p2659_p8, %p2962_p11  ;;  %p2668_p0 = por %p2667_p13, %p2666_p6 }
  0x57   : > { %p2662_p12 = pneg %p2661_p10 }
  0x59   : > { %p2669_p1 = pnand %p2668_p0, %p2662_p12 }
  0x5b   : > { %2672 = shalt.err (!%p2669_p1)
}
  0x5c   : > { %s2843_s9 = smov 64   ;;  %s2844_s10 = smov 4  }
  0x5d   : > { %2375 = dma.hbm_to_vmem [thread:$0]  (!%p2946_p9), %s3435_s3, 2048, %s2952_s22, [#allocation12], %s2843_s9, %s2843_s9, %s2844_s10  }
  0x5e   : > { %s2845_s15 = smov [#allocation16]   ;;  %s2673_s18 = scalar_lea.hbm %s3437_s5, 1024 }
  0x5f   : > { %s237_s30 = sshll.u32 %s2845_s15, 4  ;;  %p2674_p2 = scmp.ne.s32.totalorder %s3437_s5, %s2673_s18  ;;  %s238_s30 = int_to_ptr.vmem [resolvable:$true] %s237_s30 }
  0x60   : > { %p2680_p8 = scmp.lt.u32.totalorder %s2673_s18, %s3437_s5 }
  0x61   : > { %p2676_p3 = pnand %p2674_p2, %p2962_p11 }
  0x63   : > { %p2677_p5 = pneg %p2676_p3 }
  0x65   : > { %p2682_p10 = pnand %p2680_p8, %p2677_p5 }
  0x67   : > { %2685 = shalt.err (!%p2682_p10)
}
  0x68   : > { %s2686_s22 = scalar_lea.vmem %s238_s30, 1024  ;;  %p2694_p0 = scmp.lt.s32.totalorder %s238_s30, %s238_s30 }
  0x69   : > { %p2687_p12 = scmp.ne.s32.totalorder %s238_s30, %s2686_s22  ;;  %p2695_p1 = scmp.lt.s32.totalorder %s2686_s22, %s2686_s22 }
  0x6b   : > { %p2689_p6 = pnand %p2687_p12, %p2962_p11  ;;  %p2696_p4 = por %p2695_p1, %p2694_p0 }
  0x6d   : > { %p2690_p13 = pneg %p2689_p6 }
  0x6f   : > { %p2697_p7 = pnand %p2696_p4, %p2690_p13 }
  0x71   : > { %2700 = shalt.err (!%p2697_p7)
}
  0x72   : > { %2381 = dma.hbm_to_vmem [thread:$0]  (!%p2946_p9), %s3437_s5, 1024, %s238_s30, [#allocation15], %s2843_s9, %s2843_s9, %s2844_s10  }
  0x73   : > { %s3048_s28 = sadd.s32 1, %s2835_s14   ;;  %s36_s20 = sadd.s32 1, %s2831_s13 }
  0x74   : > { %s33_s27 = ssub.s32 %s2835_s14, %s3048_s28  ;;  %p43_p4 = scmp.ne.s32.totalorder %s2831_s13, %s2827_s12 }
  0x75   : > { %p34_p7 = scmp.eq.s32.totalorder %s33_s27, 0  ;;  %p44_p11 = scmp.eq.s32.totalorder %s2835_s14, 0 }
  0x76   : > { %p49_p2 = scmp.ne.s32.totalorder %s2827_s12, %s2823_s11  ;;  %p2390_p3 = scmp.lt.s32.totalorder %s2835_s14, 3 }
  0x77   : > { %s3060_s29 = scalar_select %p34_p7, %s2831_s13, %s36_s20  }
  0x78   : > { %p45_p5 = por %p44_p11, %p43_p4  ;;  %p3445_p8 = scmp.eq.s32.totalorder %s2930_s16, 0 }
  0x79   : > { %s251_s8 = sand.u32 1, %s2831_s13   ;;  %s1918_s9 = sshll.u32 %s2835_s14, 7 }
  0x7a   : > { %p3064_p10 = por %p3445_p8, %p49_p2  ;;  %s1917_s10 = sshll.u32 %s251_s8, 3 }
  0x7b   : > { %s3073_s18 = scalar_lea.hbm %s3433_s1, %s1918_s9  ;;  %s255_s11 = scalar_lea.vmem [#allocation8], %s1917_s10 }
  0x7c   : > { %s262_s21 = sshll.u32 %s255_s11, 4  ;;  %p3075_p9 = pnand %p2390_p3, %p45_p5  ;;  %s3079_s21 = int_to_ptr.vmem [resolvable:$true] %s262_s21 }
  0x7d   : > { %s252_s14 = scalar_lea.sflag [#allocation9], %s251_s8  ;;  %s2701_s24 = scalar_lea.hbm %s3073_s18, 128 }
  0x7e   : > { %p2702_p12 = scmp.ne.s32.totalorder %s3073_s18, %s2701_s24  ;;  %p2703_p6 = pneg %p3075_p9 }
  0x7f   : > { %s2706_s26 = scalar_lea.hbm %s3433_s1, 384  ;;  %p2707_p1 = scmp.lt.u32.totalorder %s3073_s18, %s3433_s1 }
  0x80   : > { %p2704_p13 = pnand %p2703_p6, %p2702_p12  ;;  %p2708_p4 = scmp.lt.u32.totalorder %s2706_s26, %s2701_s24 }
  0x81   : > { %p2710_p11 = scmp.lt.u32.totalorder %s2701_s24, %s3073_s18 }
  0x82   : > { %p2705_p0 = pneg %p2704_p13  ;;  %p2709_p7 = por %p2708_p4, %p2707_p1 }
  0x84   : > { %p2711_p2 = por %p2710_p11, %p2709_p7 }
  0x86   : > { %p2712_p3 = pnand %p2711_p2, %p2705_p0 }
  0x88   : > { %2715 = shalt.err (!%p2712_p3)
}
  0x89   : > { %s2716_s27 = scalar_lea.vmem %s3079_s21, 128  ;;  %s2846_s8 = smov [#allocation8]  }
  0x8a   : > { %p2717_p5 = scmp.ne.s32.totalorder %s3079_s21, %s2716_s27  ;;  %s2721_s9 = sshll.u32 %s2846_s8, 4  ;;  %s2722_s9 = int_to_ptr.vmem [resolvable:$false] %s2721_s9 }
  0x8b   : > { %s2723_s10 = scalar_lea.vmem %s2722_s9, 256  ;;  %p2724_p13 = scmp.lt.s32.totalorder %s3079_s21, %s2722_s9 }
  0x8c   : > { %p2719_p8 = pnand %p2717_p5, %p2703_p6  ;;  %p2725_p1 = scmp.lt.s32.totalorder %s2723_s10, %s2716_s27 }
  0x8e   : > { %p2720_p12 = pneg %p2719_p8  ;;  %p2726_p4 = por %p2725_p1, %p2724_p13 }
  0x90   : > { %p2727_p7 = pnand %p2726_p4, %p2720_p12 }
  0x92   : > { %2730 = shalt.err (!%p2727_p7)
}
  0x93   : > { %2385 = dma.hbm_to_vmem [thread:$0]  (!%p3075_p9), %s3073_s18, 128, %s3079_s21, %s252_s14  }
  0x94   : > { %p3448_p0 = scmp.ne.s32.totalorder %s3442_s17, 0 }
  0x95   : > { %s273_s30 = sand.u32 (!%p3448_p0), 1, %s2827_s12  }
  0x96   : > { %271 = sbr.rel (%p3448_p0) target bundleno = 1278 (0x4fe), region = 40  ;;  %s3109_s0 = sshll.u32 (!%p3448_p0), %s273_s30, 3 }
  0x97   : > { %s274_s11 = scalar_lea.sflag (!%p3448_p0), [#allocation9], %s273_s30  ;;  %s277_s24 = scalar_lea.vmem (!%p3448_p0), [#allocation8], %s3109_s0 }
  0x9d   : > { %2802 = dma.done.wait (%p3064_p10), %s274_s11, 128  }
  0x9e   : > { %2804 = vsyncadd (%p3064_p10), %s274_s11, 4294967168  ;;  %p3449_p6 = scmp.eq.s32.totalorder %s2930_s16, 0 }
  0xa0   : > { %2806 = dma.done.wait (%p3449_p6), [#allocation12], 8192   ;;  %p3450_p9 = pmov %p3449_p6 }
  0xa1   : > { %p3451_p11 = pmov %p3449_p6 }
  0xa2   : > { %2808 = vsyncadd (%p3450_p9), [#allocation12], 4294959104 }
  0xa3   : > { %2810 = dma.done.wait (%p3451_p11), [#allocation15], 4096   ;;  %p3452_p2 = pmov %p3449_p6 }
  0xa4   : > { %s3125_s17 = sld [smem:[#allocation7 + %s2930_s16]]  ;;  %p3453_p3 = scmp.ne.s32.totalorder %s2930_s16, 0 }
  0xa5   : > { %2812 = vsyncadd (%p3452_p2), [#allocation15], 4294963200  ;;  %v2847_v0 = vmov (!%p3453_p3), 0  }
  0xa6   : > { %322 = sbr.rel (%p3453_p3) target bundleno = 182 (0xb6), region = 64  ;;  %323 = vst [vmem:[#allocation2] sm:$0xff] (!%p3453_p3), %v2847_v0  ;;  %324 = vst [vmem:[#allocation2 + $0x8] sm:$0xff] (!%p3453_p3), %v2847_v0 }
  0xa7   : > { %325 = vst [vmem:[#allocation2 + $0x10] sm:$0xff] (!%p3453_p3), %v2847_v0  ;;  %326 = vst [vmem:[#allocation2 + $0x18] sm:$0xff] (!%p3453_p3), %v2847_v0 }
  0xa8   : > { %327 = vst [vmem:[#allocation2 + $0x20] sm:$0xff] (!%p3453_p3), %v2847_v0  ;;  %328 = vst [vmem:[#allocation2 + $0x28] sm:$0xff] (!%p3453_p3), %v2847_v0 }
  0xa9   : > { %329 = vst [vmem:[#allocation2 + $0x30] sm:$0xff] (!%p3453_p3), %v2847_v0  ;;  %330 = vst [vmem:[#allocation2 + $0x38] sm:$0xff] (!%p3453_p3), %v2847_v0 }
  0xaa   : > { %331 = vst [vmem:[#allocation2 + $0x40] sm:$0xff] (!%p3453_p3), %v2847_v0  ;;  %332 = vst [vmem:[#allocation2 + $0x48] sm:$0xff] (!%p3453_p3), %v2847_v0 }
  0xab   : > { %333 = vst [vmem:[#allocation2 + $0x50] sm:$0xff] (!%p3453_p3), %v2847_v0  ;;  %334 = vst [vmem:[#allocation2 + $0x58] sm:$0xff] (!%p3453_p3), %v2847_v0 }
  0xac   : > { %335 = vst [vmem:[#allocation2 + $0x60] sm:$0xff] (!%p3453_p3), %v2847_v0  ;;  %336 = vst [vmem:[#allocation2 + $0x68] sm:$0xff] (!%p3453_p3), %v2847_v0 }
  0xad   : > { %337 = vst [vmem:[#allocation2 + $0x70] sm:$0xff] %v2847_v0  ;;  %338 = vst [vmem:[#allocation2 + $0x78] sm:$0xff] %v2847_v0 }
  0xae   : > { %339 = vst [vmem:[#allocation3] sm:$0xff] %v2847_v0  ;;  %340 = vst [vmem:[#allocation3 + $0x8] sm:$0xff] %v2847_v0 }
  0xaf   : > { %341 = vst [vmem:[#allocation3 + $0x10] sm:$0xff] %v2847_v0  ;;  %342 = vst [vmem:[#allocation3 + $0x18] sm:$0xff] %v2847_v0 }
  0xb0   : > { %343 = vst [vmem:[#allocation3 + $0x20] sm:$0xff] %v2847_v0  ;;  %344 = vst [vmem:[#allocation3 + $0x28] sm:$0xff] %v2847_v0 }
  0xb1   : > { %345 = vst [vmem:[#allocation3 + $0x30] sm:$0xff] %v2847_v0  ;;  %346 = vst [vmem:[#allocation3 + $0x38] sm:$0xff] %v2847_v0 }
  0xb2   : > { %347 = vst [vmem:[#allocation3 + $0x40] sm:$0xff] %v2847_v0  ;;  %348 = vst [vmem:[#allocation3 + $0x48] sm:$0xff] %v2847_v0 }
  0xb3   : > { %349 = vst [vmem:[#allocation3 + $0x50] sm:$0xff] %v2847_v0  ;;  %350 = vst [vmem:[#allocation3 + $0x58] sm:$0xff] %v2847_v0 }
  0xb4   : > { %351 = vst [vmem:[#allocation3 + $0x60] sm:$0xff] %v2847_v0  ;;  %352 = vst [vmem:[#allocation3 + $0x68] sm:$0xff] %v2847_v0 }
  0xb5   : > { %353 = vst [vmem:[#allocation3 + $0x70] sm:$0xff] %v2847_v0  ;;  %354 = vst [vmem:[#allocation3 + $0x78] sm:$0xff] %v2847_v0 }
  0xb6 PF: > { %v3131_v1 = vld [vmem:[%s277_s24] sm:$0xff]  ;;  %v2848_v2 = vmov 0.0   ;;  %p1926_p10 = scmp.le.s32.totalorder %s3125_s17, 0 }
  0xb7   : > { %356 = vst [vmem:[#allocation4] sm:$0xff] %v2848_v2  ;;  %357 = vst [vmem:[#allocation4 + $0x8] sm:$0xff] %v2848_v2  ;;  %v392_v3 = vlaneseq (!%p1926_p10)  ;;  %v557_v6 = vld [vmem:[#allocation2] sm:$0xff] (!%p1926_p10)  ;;  %v558_v11 = vld [vmem:[#allocation2 + $0x8] sm:$0xff] (!%p1926_p10)  ;;  %v2849_v34 = vmov (!%p1926_p10), 0.0  }
  0xb8   : > { %358 = vst [vmem:[#allocation4 + $0x10] sm:$0xff] %v2848_v2  ;;  %359 = vst [vmem:[#allocation4 + $0x18] sm:$0xff] %v2848_v2  ;;  %v750_v7 = vld [vmem:[#allocation3] sm:$0xff] (!%p1926_p10)  ;;  %v751_v12 = vld [vmem:[#allocation3 + $0x8] sm:$0xff] (!%p1926_p10) }
  0xb9   : > { %360 = vst [vmem:[#allocation4 + $0x20] sm:$0xff] %v2848_v2  ;;  %361 = vst [vmem:[#allocation4 + $0x28] sm:$0xff] %v2848_v2  ;;  %v758_v5 = vld [vmem:[#allocation3 + $0x40] sm:$0xff] (!%p1926_p10)  ;;  %v759_v9 = vld [vmem:[#allocation3 + $0x48] sm:$0xff] (!%p1926_p10)  ;;  %v3166_v10 = vshrl.u32 (!%p1926_p10), %v392_v3, 7 }
  0xba   : > { %362 = vst [vmem:[#allocation4 + $0x30] sm:$0xff] %v2848_v2  ;;  %363 = vst [vmem:[#allocation4 + $0x38] sm:$0xff] %v2848_v2  ;;  %v565_v4 = vld [vmem:[#allocation2 + $0x40] sm:$0xff] (!%p1926_p10)  ;;  %2101 = vmatprep.subr.bf16.mxu1 (!%p1926_p10), %v758_v5  ;;  %v566_v8 = vld [vmem:[#allocation2 + $0x48] sm:$0xff] (!%p1926_p10) }
  0xbb   : > { %364 = vst [vmem:[#allocation4 + $0x40] sm:$0xff] %v2848_v2  ;;  %365 = vst [vmem:[#allocation4 + $0x48] sm:$0xff] %v2848_v2  ;;  %2037 = vmatprep.subr.bf16.mxu0 (!%p1926_p10), %v565_v4  ;;  %2102 = vmatpush3.bf16.msra.mxu1 (!%p1926_p10), %v750_v7  ;;  %v409_v13 = vadd.s32 (!%p1926_p10), 128, %v3166_v10  ;;  %v410_v14 = vadd.s32 (!%p1926_p10), 136, %v3166_v10  ;;  %v427_v15 = vsub.s32 (!%p1926_p10), 0, %v3166_v10  ;;  %v394_v16 = vadd.s32 (!%p1926_p10), 8, %v3166_v10 }
  0xbc   : > { %366 = vst [vmem:[#allocation4 + $0x50] sm:$0xff] %v2848_v2  ;;  %367 = vst [vmem:[#allocation4 + $0x58] sm:$0xff] %v2848_v2  ;;  %2038 = vmatpush3.bf16.msra.mxu0 (!%p1926_p10), %v557_v6  ;;  %2103 = vmatprep.subr.bf16.mxu1 (!%p1926_p10), %v759_v9  ;;  %v567_v17 = vld [vmem:[#allocation2 + $0x50] sm:$0xff] (!%p1926_p10)  ;;  %v411_v19 = vadd.s32 (!%p1926_p10), 144, %v3166_v10  ;;  %v412_v20 = vadd.s32 (!%p1926_p10), 152, %v3166_v10  ;;  %v395_v21 = vadd.s32 (!%p1926_p10), 16, %v3166_v10 }
  0xbd   : > { %368 = vst [vmem:[#allocation4 + $0x60] sm:$0xff] %v2848_v2  ;;  %369 = vst [vmem:[#allocation4 + $0x68] sm:$0xff] %v2848_v2  ;;  %2039 = vmatprep.subr.bf16.mxu0 (!%p1926_p10), %v566_v8  ;;  %v760_v18 = vld [vmem:[#allocation3 + $0x50] sm:$0xff] (!%p1926_p10)  ;;  %v396_v22 = vadd.s32 (!%p1926_p10), 24, %v3166_v10  ;;  %v3177_v23 = vrot.slane (!%p1926_p10), %v3131_v1, %v427_v15  ;;  %v413_v24 = vadd.s32 (!%p1926_p10), 160, %v3166_v10  ;;  %v414_v25 = vadd.s32 (!%p1926_p10), 168, %v3166_v10 }
  0xbe   : > { %370 = vst [vmem:[#allocation4 + $0x70] sm:$0xff] %v2848_v2  ;;  %371 = vst [vmem:[#allocation4 + $0x78] sm:$0xff] %v2848_v2  ;;  %v397_v26 = vadd.s32 (!%p1926_p10), 32, %v3166_v10  ;;  %v398_v27 = vadd.s32 (!%p1926_p10), 40, %v3166_v10  ;;  %v415_v28 = vadd.s32 (!%p1926_p10), 176, %v3166_v10  ;;  %v416_v29 = vadd.s32 (!%p1926_p10), 184, %v3166_v10 }
  0xbf   : > { %372 = vst [vmem:[#allocation5] sm:$0xff] %v2848_v2  ;;  %373 = vst [vmem:[#allocation5 + $0x8] sm:$0xff] %v2848_v2  ;;  %2104 = vmatpush3.bf16.msra.mxu1 (!%p1926_p10), %v751_v12  ;;  %v3186_v30 = vadd.s32 (!%p1926_p10), 48, %v3166_v10  ;;  %v559_v31 = vld [vmem:[#allocation2 + $0x10] sm:$0xff] (!%p1926_p10)  ;;  %vm445_vm0 = vcmp.eq.s32.totalorder (!%p1926_p10), %v409_v13, %v3177_v23  ;;  %vm446_vm1 = vcmp.eq.s32.totalorder (!%p1926_p10), %v410_v14, %v3177_v23  ;;  %v568_v33 = vld [vmem:[#allocation2 + $0x58] sm:$0xff] (!%p1926_p10)  ;;  %v400_v61 = vadd.s32 (!%p1926_p10), 56, %v3166_v10 }
  0xc0   : > { %374 = vst [vmem:[#allocation5 + $0x10] sm:$0xff] %v2848_v2  ;;  %375 = vst [vmem:[#allocation5 + $0x18] sm:$0xff] %v2848_v2  ;;  %391 = sbr.rel (%p1926_p10) target bundleno = 576 (0x240), region = 68  ;;  %2040 = vmatpush3.bf16.msra.mxu0 (!%p1926_p10), %v558_v11  ;;  %2105 = vmatprep.subr.bf16.mxu1 (!%p1926_p10), %v760_v18  ;;  %vm429_vm2 = vcmp.eq.s32.totalorder (!%p1926_p10), %v3166_v10, %v3177_v23  ;;  %vm430_vm3 = vcmp.eq.s32.totalorder (!%p1926_p10), %v394_v16, %v3177_v23  ;;  %v752_v32 = vld [vmem:[#allocation3 + $0x10] sm:$0xff] (!%p1926_p10)  ;;  %v1943_v35 = vsel (!%p1926_p10), %vm445_vm0, 1.0, %v2849_v34  ;;  %v761_v41 = vld [vmem:[#allocation3 + $0x58] sm:$0xff] (!%p1926_p10) }
  0xc1   : > { %376 = vst [vmem:[#allocation5 + $0x20] sm:$0xff] %v2848_v2  ;;  %377 = vst [vmem:[#allocation5 + $0x28] sm:$0xff] %v2848_v2  ;;  %2041 = vmatprep.subr.bf16.mxu0 (!%p1926_p10), %v567_v17  ;;  %v1944_v36 = vsel (!%p1926_p10), %vm446_vm1, 1.0, %v2849_v34  ;;  %v1927_v37 = vsel (!%p1926_p10), %vm429_vm2, 1.0, %v2849_v34  ;;  %v1928_v38 = vsel (!%p1926_p10), %vm430_vm3, 1.0, %v2849_v34  ;;  %vm447_vm4 = vcmp.eq.s32.totalorder (!%p1926_p10), %v411_v19, %v3177_v23  ;;  %v560_v44 = vld [vmem:[#allocation2 + $0x18] sm:$0xff] (!%p1926_p10) }
  0xc2   : > { %378 = vst [vmem:[#allocation5 + $0x30] sm:$0xff] %v2848_v2  ;;  %379 = vst [vmem:[#allocation5 + $0x38] sm:$0xff] %v2848_v2  ;;  %v533_v39 = vpack.c.bf16 (!%p1926_p10), %v1944_v36, %v1943_v35  ;;  %v525_v40 = vpack.c.bf16 (!%p1926_p10), %v1928_v38, %v1927_v37  ;;  %vm448_vm5 = vcmp.eq.s32.totalorder (!%p1926_p10), %v412_v20, %v3177_v23  ;;  %v1945_v42 = vsel (!%p1926_p10), %vm447_vm4, 1.0, %v2849_v34  ;;  %v753_v48 = vld [vmem:[#allocation3 + $0x18] sm:$0xff] (!%p1926_p10)  ;;  %v569_v49 = vld [vmem:[#allocation2 + $0x60] sm:$0xff] (!%p1926_p10) }
  0xc3   : > { %380 = vst [vmem:[#allocation5 + $0x40] sm:$0xff] %v2848_v2  ;;  %381 = vst [vmem:[#allocation5 + $0x48] sm:$0xff] %v2848_v2  ;;  %v1946_v43 = vsel (!%p1926_p10), %vm448_vm5, 1.0, %v2849_v34  ;;  %vm431_vm6 = vcmp.eq.s32.totalorder (!%p1926_p10), %v395_v21, %v3177_v23  ;;  %vm432_vm7 = vcmp.eq.s32.totalorder (!%p1926_p10), %v396_v22, %v3177_v23  ;;  %2106 = vmatpush3.bf16.msra.mxu1 (!%p1926_p10), %v752_v32  ;;  %v762_v54 = vld [vmem:[#allocation3 + $0x60] sm:$0xff] (!%p1926_p10)  ;;  %v570_v63 = vld [vmem:[#allocation2 + $0x68] sm:$0xff] (!%p1926_p10)  ;;  %v417_v4 = vadd.s32 (!%p1926_p10), 192, %v3166_v10 }
  0xc4   : > { %382 = vst [vmem:[#allocation5 + $0x50] sm:$0xff] %v2848_v2  ;;  %383 = vst [vmem:[#allocation5 + $0x58] sm:$0xff] %v2848_v2  ;;  %2042 = vmatpush3.bf16.msra.mxu0 (!%p1926_p10), %v559_v31  ;;  %589 = vxpose.xlu0.c.b16.start [1/8] (!%p1926_p10), %v533_v39, 128  ;;  %v534_v45 = vpack.c.bf16 (!%p1926_p10), %v1946_v43, %v1945_v42  ;;  %v1929_v46 = vsel (!%p1926_p10), %vm431_vm6, 1.0, %v2849_v34  ;;  %v1930_v47 = vsel (!%p1926_p10), %vm432_vm7, 1.0, %v2849_v34  ;;  %v561_v58 = vld [vmem:[#allocation2 + $0x20] sm:$0xff] (!%p1926_p10)  ;;  %v418_v5 = vadd.s32 (!%p1926_p10), 200, %v3166_v10 }
  0xc5   : > { %384 = vst [vmem:[#allocation5 + $0x60] sm:$0xff] %v2848_v2  ;;  %385 = vst [vmem:[#allocation5 + $0x68] sm:$0xff] %v2848_v2  ;;  %2043 = vmatprep.subr.bf16.mxu0 (!%p1926_p10), %v568_v33  ;;  %573 = vxpose.xlu1.c.b16.start [1/8] (!%p1926_p10), %v525_v40, 128  ;;  %vm449_vm8 = vcmp.eq.s32.totalorder (!%p1926_p10), %v413_v24, %v3177_v23  ;;  %v526_v50 = vpack.c.bf16 (!%p1926_p10), %v1930_v47, %v1929_v46  ;;  %v754_v62 = vld [vmem:[#allocation3 + $0x20] sm:$0xff] (!%p1926_p10)  ;;  %v401_v6 = vadd.s32 (!%p1926_p10), 64, %v3166_v10  ;;  %v763_v9 = vld [vmem:[#allocation3 + $0x68] sm:$0xff] (!%p1926_p10) }
  0xc6   : > { %386 = vst [vmem:[#allocation5 + $0x70] sm:$0xff] %v2848_v2  ;;  %387 = vst [vmem:[#allocation5 + $0x78] sm:$0xff] %v2848_v2  ;;  %vm450_vm9 = vcmp.eq.s32.totalorder (!%p1926_p10), %v414_v25, %v3177_v23  ;;  %v1947_v51 = vsel (!%p1926_p10), %vm449_vm8, 1.0, %v2849_v34  ;;  %vm433_vm10 = vcmp.eq.s32.totalorder (!%p1926_p10), %v397_v26, %v3177_v23  ;;  %2107 = vmatprep.subr.bf16.mxu1 (!%p1926_p10), %v761_v41  ;;  %v402_v7 = vadd.s32 (!%p1926_p10), 72, %v3166_v10  ;;  %v562_v13 = vld [vmem:[#allocation2 + $0x28] sm:$0xff] (!%p1926_p10)  ;;  %v571_v18 = vld [vmem:[#allocation2 + $0x70] sm:$0xff] (!%p1926_p10) }
  0xc7   : > { %v1948_v52 = vsel %vm450_vm9, 1.0, %v2849_v34  ;;  %vm434_vm11 = vcmp.eq.s32.totalorder %v398_v27, %v3177_v23  ;;  %v1931_v53 = vsel %vm433_vm10, 1.0, %v2849_v34  ;;  %vm451_vm12 = vcmp.eq.s32.totalorder %v415_v28, %v3177_v23  ;;  %2108 = vmatpush3.bf16.msra.mxu1 %v753_v48  ;;  %v755_v17 = vld [vmem:[#allocation3 + $0x28] sm:$0xff]  ;;  %v764_v24 = vld [vmem:[#allocation3 + $0x70] sm:$0xff]  ;;  %v572_v35 = vld [vmem:[#allocation2 + $0x78] sm:$0xff] }
  0xc8   : > { %2044 = vmatpush3.bf16.msra.mxu0 %v560_v44  ;;  %v535_v55 = vpack.c.bf16 %v1948_v52, %v1947_v51  ;;  %v1932_v56 = vsel %vm434_vm11, 1.0, %v2849_v34  ;;  %vm452_vm13 = vcmp.eq.s32.totalorder %v416_v29, %v3177_v23  ;;  %v1949_v57 = vsel %vm451_vm12, 1.0, %v2849_v34  ;;  %590 = vxpose.xlu0.c.b16.cont [2/8] %v534_v45, 128  ;;  %v563_v29 = vld [vmem:[#allocation2 + $0x30] sm:$0xff]  ;;  %v765_v39 = vld [vmem:[#allocation3 + $0x78] sm:$0xff] }
  0xc9   : > { %2045 = vmatprep.subr.bf16.mxu0 %v569_v49  ;;  %574 = vxpose.xlu1.c.b16.cont [2/8] %v526_v50, 128  ;;  %v527_v59 = vpack.c.bf16 %v1932_v56, %v1931_v53  ;;  %v1950_v60 = vsel %vm452_vm13, 1.0, %v2849_v34  ;;  %vm435_vm14 = vcmp.eq.s32.totalorder %v3186_v30, %v3177_v23  ;;  %vm436_vm15 = vcmp.eq.s32.totalorder %v400_v61, %v3177_v23  ;;  %v756_v33 = vld [vmem:[#allocation3 + $0x30] sm:$0xff]  ;;  %v564_v42 = vld [vmem:[#allocation2 + $0x38] sm:$0xff] }
  0xca   : > { %v536_v0 = vpack.c.bf16 %v1950_v60, %v1949_v57  ;;  %v1933_v3 = vsel %vm435_vm14, 1.0, %v2849_v34  ;;  %2109 = vmatprep.subr.bf16.mxu1 %v762_v54  ;;  %v419_v8 = vadd.s32 208, %v3166_v10  ;;  %v1934_v11 = vsel %vm436_vm15, 1.0, %v2849_v34  ;;  %v757_v47 = vld [vmem:[#allocation3 + $0x38] sm:$0xff] }
  0xcb   : > { %vm453_vm0 = vcmp.eq.s32.totalorder %v417_v4, %v3177_v23  ;;  %vm454_vm1 = vcmp.eq.s32.totalorder %v418_v5, %v3177_v23  ;;  %v420_v12 = vadd.s32 216, %v3166_v10  ;;  %2110 = vmatpush3.bf16.msra.mxu1 %v754_v62  ;;  %v528_v14 = vpack.c.bf16 %v1934_v11, %v1933_v3 }
  0xcc   : > { %2046 = vmatpush3.bf16.msra.mxu0 %v561_v58  ;;  %591 = vxpose.xlu0.c.b16.cont [3/8] %v535_v55, 128  ;;  %v1951_v15 = vsel %vm453_vm0, 1.0, %v2849_v34  ;;  %v1952_v16 = vsel %vm454_vm1, 1.0, %v2849_v34  ;;  %vm437_vm2 = vcmp.eq.s32.totalorder %v401_v6, %v3177_v23  ;;  %vm438_vm3 = vcmp.eq.s32.totalorder %v402_v7, %v3177_v23 }
  0xcd   : > { %2047 = vmatprep.subr.bf16.mxu0 %v570_v63  ;;  %575 = vxpose.xlu1.c.b16.cont [3/8] %v527_v59, 128  ;;  %v1935_v19 = vsel %vm437_vm2, 1.0, %v2849_v34  ;;  %vm455_vm4 = vcmp.eq.s32.totalorder %v419_v8, %v3177_v23  ;;  %v537_v20 = vpack.c.bf16 %v1952_v16, %v1951_v15  ;;  %v1936_v21 = vsel %vm438_vm3, 1.0, %v2849_v34  ;;  %v734_v16 = vld [vmem:[#allocation5] sm:$0xff] }
  0xce   : > { %2111 = vmatprep.subr.bf16.mxu1 %v763_v9  ;;  %vm456_vm5 = vcmp.eq.s32.totalorder %v420_v12, %v3177_v23  ;;  %v403_v22 = vadd.s32 80, %v3166_v10  ;;  %v529_v25 = vpack.c.bf16 %v1936_v21, %v1935_v19  ;;  %v1953_v26 = vsel %vm455_vm4, 1.0, %v2849_v34 }
  0xcf   : > { %v404_v27 = vadd.s32 88, %v3166_v10  ;;  %v421_v28 = vadd.s32 224, %v3166_v10  ;;  %2112 = vmatpush3.bf16.msra.mxu1 %v755_v17  ;;  %v1954_v30 = vsel %vm456_vm5, 1.0, %v2849_v34  ;;  %v422_v31 = vadd.s32 232, %v3166_v10 }
  0xd0   : > { %2048 = vmatpush3.bf16.msra.mxu0 %v562_v13  ;;  %592 = vxpose.xlu0.c.b16.cont [4/8] %v536_v0, 128  ;;  %vm439_vm6 = vcmp.eq.s32.totalorder %v403_v22, %v3177_v23  ;;  %v405_v32 = vadd.s32 96, %v3166_v10  ;;  %v406_v37 = vadd.s32 104, %v3166_v10  ;;  %v538_v40 = vpack.c.bf16 %v1954_v30, %v1953_v26  ;;  %v542_v22 = vld [vmem:[#allocation4 + $0x8] sm:$0xff] }
  0xd1   : > { %2049 = vmatprep.subr.bf16.mxu0 %v571_v18  ;;  %576 = vxpose.xlu1.c.b16.cont [4/8] %v528_v14, 128  ;;  %vm440_vm7 = vcmp.eq.s32.totalorder %v404_v27, %v3177_v23  ;;  %v1937_v36 = vsel %vm439_vm6, 1.0, %v2849_v34  ;;  %vm457_vm8 = vcmp.eq.s32.totalorder %v421_v28, %v3177_v23  ;;  %vm458_vm9 = vcmp.eq.s32.totalorder %v422_v31, %v3177_v23  ;;  %v541_v14 = vld [vmem:[#allocation4] sm:$0xff] }
  0xd2   : > { %2113 = vmatprep.subr.bf16.mxu1 %v764_v24  ;;  %v1938_v38 = vsel %vm440_vm7, 1.0, %v2849_v34  ;;  %vm441_vm10 = vcmp.eq.s32.totalorder %v405_v32, %v3177_v23  ;;  %v1955_v41 = vsel %vm457_vm8, 1.0, %v2849_v34  ;;  %vm442_vm11 = vcmp.eq.s32.totalorder %v406_v37, %v3177_v23 }
  0xd3   : > { %2114 = vmatpush3.bf16.msra.mxu1 %v756_v33  ;;  %v530_v43 = vpack.c.bf16 %v1938_v38, %v1937_v36  ;;  %v1956_v44 = vsel %vm458_vm9, 1.0, %v2849_v34  ;;  %v423_v45 = vadd.s32 240, %v3166_v10  ;;  %v424_v46 = vadd.s32 248, %v3166_v10  ;;  %v543_v36 = vld [vmem:[#allocation4 + $0x10] sm:$0xff] }
  0xd4   : > { %2050 = vmatpush3.bf16.msra.mxu0 %v563_v29  ;;  %593 = vxpose.xlu0.c.b16.cont [5/8] %v537_v20, 128  ;;  %v1939_v48 = vsel %vm441_vm10, 1.0, %v2849_v34  ;;  %v1940_v49 = vsel %vm442_vm11, 1.0, %v2849_v34  ;;  %v407_v50 = vadd.s32 112, %v3166_v10  ;;  %v408_v51 = vadd.s32 120, %v3166_v10  ;;  %v736_v38 = vld [vmem:[#allocation5 + $0x10] sm:$0xff] }
  0xd5   : > { %2051 = vmatprep.subr.bf16.mxu0 %v572_v35  ;;  %577 = vxpose.xlu1.c.b16.cont [5/8] %v529_v25, 128  ;;  %vm459_vm12 = vcmp.eq.s32.totalorder %v423_v45, %v3177_v23  ;;  %vm460_vm13 = vcmp.eq.s32.totalorder %v424_v46, %v3177_v23  ;;  %v539_v52 = vpack.c.bf16 %v1956_v44, %v1955_v41  ;;  %v735_v25 = vld [vmem:[#allocation5 + $0x8] sm:$0xff]  ;;  %v544_v44 = vld [vmem:[#allocation4 + $0x18] sm:$0xff] }
  0xd6   : > { %2115 = vmatprep.subr.bf16.mxu1 %v765_v39  ;;  %vm443_vm14 = vcmp.eq.s32.totalorder %v407_v50, %v3177_v23  ;;  %vm444_vm15 = vcmp.eq.s32.totalorder %v408_v51, %v3177_v23  ;;  %v531_v53 = vpack.c.bf16 %v1940_v49, %v1939_v48  ;;  %v1957_v54 = vsel %vm459_vm12, 1.0, %v2849_v34  ;;  %v737_v46 = vld [vmem:[#allocation5 + $0x18] sm:$0xff] }
  0xd7   : > { %2116 = vmatpush3.bf16.msra.mxu1 %v757_v47  ;;  %v1958_v55 = vsel %vm460_vm13, 1.0, %v2849_v34  ;;  %v1941_v10 = vsel %vm443_vm14, 1.0, %v2849_v34  ;;  %v1942_v56 = vsel %vm444_vm15, 1.0, %v2849_v34 }
  0xd8   : > { %2052 = vmatpush3.bf16.msra.mxu0 %v564_v42  ;;  %594 = vxpose.xlu0.c.b16.cont [6/8] %v538_v40, 128  ;;  %v540_v57 = vpack.c.bf16 %v1958_v55, %v1957_v54  ;;  %v532_v58 = vpack.c.bf16 %v1942_v56, %v1941_v10  ;;  %v545_v10 = vld [vmem:[#allocation4 + $0x20] sm:$0xff] }
  0xd9   : > { %578 = vxpose.xlu1.c.b16.cont [6/8] %v530_v43, 128 }
  0xdc   : > { %595 = vxpose.xlu0.c.b16.cont [7/8] %v539_v52, 128 }
  0xdd   : > { %579 = vxpose.xlu1.c.b16.cont [7/8] %v531_v53, 128 }
  0xe0   : > { %596 = vxpose.xlu0.c.b16.end [8/8] %v540_v57, 128  ;;  %v738_v57 = vld [vmem:[#allocation5 + $0x20] sm:$0xff] }
  0xe1   : > { %580 = vxpose.xlu1.c.b16.end [8/8] %v532_v58, 128 }
 0x12a   : > { %v597_v23 = vpop.trf.xlu0 }
 0x12b   : > { %v581_v59 = vpop.trf.xlu1  ;;  %637 = vmatprep.mubr.bf16.mxu0 %v597_v23  ;;  %798 = vmatprep.mubr.bf16.mxu1 %v597_v23 }
 0x12c   : > { %638 = vmatmul.mubr.bf16.vlgmr.msra.gmra.mrb[0].mxu0 %v581_v59  ;;  %799 = vmatmul.mubr.bf16.vlgmr.msra.gmra.mrb[0].mxu1 %v581_v59 }
 0x12e   : > { %v598_v60 = vpop.trf.xlu0 }
 0x12f   : > { %645 = vmatprep.mubr.bf16.mxu0 %v598_v60  ;;  %806 = vmatprep.mubr.bf16.mxu1 %v598_v60  ;;  %v582_v61 = vpop.trf.xlu1 }
 0x132   : > { %v599_v62 = vpop.trf.xlu0 }
 0x133   : > { %v583_v34 = vpop.trf.xlu1 }
 0x134   : > { %646 = vmatmul.mubr.bf16.gmra.mrb[4].mxu0 %v582_v61  ;;  %807 = vmatmul.mubr.bf16.gmra.mrb[4].mxu1 %v582_v61 }
 0x135   : > { %653 = vmatprep.mubr.bf16.mxu0 %v599_v62  ;;  %814 = vmatprep.mubr.bf16.mxu1 %v599_v62  ;;  %v546_v62 = vld [vmem:[#allocation4 + $0x28] sm:$0xff] }
 0x136   : > { %v600_v63 = vpop.trf.xlu0 }
 0x137   : > { %v584_v0 = vpop.trf.xlu1 }
 0x13a   : > { %v601_v3 = vpop.trf.xlu0 }
 0x13b   : > { %v585_v4 = vpop.trf.xlu1 }
 0x13c   : > { %654 = vmatmul.mubr.bf16.gmra.mrb[8].mxu0 %v583_v34  ;;  %815 = vmatmul.mubr.bf16.gmra.mrb[8].mxu1 %v583_v34 }
 0x13d   : > { %661 = vmatprep.mubr.bf16.mxu0 %v600_v63  ;;  %822 = vmatprep.mubr.bf16.mxu1 %v600_v63  ;;  %v739_v63 = vld [vmem:[#allocation5 + $0x28] sm:$0xff] }
 0x13e   : > { %v602_v5 = vpop.trf.xlu0 }
 0x13f   : > { %v586_v6 = vpop.trf.xlu1 }
 0x142   : > { %v603_v7 = vpop.trf.xlu0 }
 0x143   : > { %v587_v8 = vpop.trf.xlu1 }
 0x144   : > { %662 = vmatmul.mubr.bf16.gmra.mrb[12].mxu0 %v584_v0  ;;  %823 = vmatmul.mubr.bf16.gmra.mrb[12].mxu1 %v584_v0 }
 0x145   : > { %669 = vmatprep.mubr.bf16.mxu0 %v601_v3  ;;  %830 = vmatprep.mubr.bf16.mxu1 %v601_v3 }
 0x146   : > { %v604_v9 = vpop.trf.xlu0 }
 0x147   : > { %v588_v11 = vpop.trf.xlu1 }
 0x14c   : > { %670 = vmatmul.mubr.bf16.gmra.mrb[16].mxu0 %v585_v4  ;;  %831 = vmatmul.mubr.bf16.gmra.mrb[16].mxu1 %v585_v4 }
 0x14d   : > { %677 = vmatprep.mubr.bf16.mxu0 %v602_v5  ;;  %838 = vmatprep.mubr.bf16.mxu1 %v602_v5 }
 0x154   : > { %678 = vmatmul.mubr.bf16.gmra.mrb[20].mxu0 %v586_v6  ;;  %839 = vmatmul.mubr.bf16.gmra.mrb[20].mxu1 %v586_v6 }
 0x155   : > { %685 = vmatprep.mubr.bf16.mxu0 %v603_v7  ;;  %846 = vmatprep.mubr.bf16.mxu1 %v603_v7 }
 0x15c   : > { %686 = vmatmul.mubr.bf16.gmra.mrb[24].mxu0 %v587_v8  ;;  %847 = vmatmul.mubr.bf16.gmra.mrb[24].mxu1 %v587_v8 }
 0x15d   : > { %693 = vmatprep.mubr.bf16.mxu0 %v604_v9  ;;  %854 = vmatprep.mubr.bf16.mxu1 %v604_v9 }
 0x164   : > { %694 = vmatmul.mubr.bf16.gmra.mrb[28].mxu0 %v588_v11  ;;  %855 = vmatmul.mubr.bf16.gmra.mrb[28].mxu1 %v588_v11 }
 0x1ff   : > { %v2053_v12 = vpop.f32.mrb[0].mxu0  ;;  %v2117_v13 = vpop.f32.mrb[0].mxu1 }
 0x200   : > { %v2054_v15 = vpop.f32.mrb[1].mxu0  ;;  %v2118_v17 = vpop.f32.mrb[1].mxu1 }
 0x201   : > { %v2055_v18 = vadd.f32 %v2054_v15, %v2053_v12  ;;  %v2119_v19 = vadd.f32 %v2118_v17, %v2117_v13  ;;  %v2056_v20 = vpop.f32.mrb[2].mxu0  ;;  %v2120_v21 = vpop.f32.mrb[2].mxu1  ;;  %v547_v12 = vld [vmem:[#allocation4 + $0x30] sm:$0xff] }
 0x202   : > { %v2057_v24 = vpop.f32.mrb[3].mxu0  ;;  %v2121_v26 = vpop.f32.mrb[3].mxu1 }
 0x203   : > { %v702_v27 = vadd.f32 %v2055_v18, %v541_v14  ;;  %v863_v28 = vadd.f32 %v2119_v19, %v734_v16  ;;  %v2058_v29 = vadd.f32 %v2057_v24, %v2056_v20  ;;  %v2122_v30 = vadd.f32 %v2121_v26, %v2120_v21  ;;  %v740_v14 = vld [vmem:[#allocation5 + $0x30] sm:$0xff]  ;;  %v548_v20 = vld [vmem:[#allocation4 + $0x38] sm:$0xff] }
 0x205   : > { %718 = vst [vmem:[#allocation4] sm:$0xff] %v702_v27  ;;  %879 = vst [vmem:[#allocation5] sm:$0xff] %v863_v28  ;;  %v703_v31 = vadd.f32 %v2058_v29, %v542_v22  ;;  %v864_v32 = vadd.f32 %v2122_v30, %v735_v25  ;;  %v741_v22 = vld [vmem:[#allocation5 + $0x38] sm:$0xff] }
 0x207   : > { %719 = vst [vmem:[#allocation4 + $0x8] sm:$0xff] %v703_v31  ;;  %880 = vst [vmem:[#allocation5 + $0x8] sm:$0xff] %v864_v32  ;;  %v2059_v33 = vpop.f32.mrb[4].mxu0  ;;  %v2123_v35 = vpop.f32.mrb[4].mxu1 }
 0x208   : > { %v2060_v37 = vpop.f32.mrb[5].mxu0  ;;  %v2124_v39 = vpop.f32.mrb[5].mxu1 }
 0x209   : > { %v2061_v40 = vadd.f32 %v2060_v37, %v2059_v33  ;;  %v2125_v41 = vadd.f32 %v2124_v39, %v2123_v35  ;;  %v2062_v42 = vpop.f32.mrb[6].mxu0  ;;  %v2126_v43 = vpop.f32.mrb[6].mxu1  ;;  %v549_v33 = vld [vmem:[#allocation4 + $0x40] sm:$0xff] }
 0x20a   : > { %v2063_v45 = vpop.f32.mrb[7].mxu0  ;;  %v2127_v47 = vpop.f32.mrb[7].mxu1 }
 0x20b   : > { %v704_v48 = vadd.f32 %v2061_v40, %v543_v36  ;;  %v865_v49 = vadd.f32 %v2125_v41, %v736_v38  ;;  %v2064_v50 = vadd.f32 %v2063_v45, %v2062_v42  ;;  %v2128_v51 = vadd.f32 %v2127_v47, %v2126_v43  ;;  %v742_v36 = vld [vmem:[#allocation5 + $0x40] sm:$0xff]  ;;  %v550_v42 = vld [vmem:[#allocation4 + $0x48] sm:$0xff] }
 0x20d   : > { %720 = vst [vmem:[#allocation4 + $0x10] sm:$0xff] %v704_v48  ;;  %881 = vst [vmem:[#allocation5 + $0x10] sm:$0xff] %v865_v49  ;;  %v705_v52 = vadd.f32 %v2064_v50, %v544_v44  ;;  %v866_v53 = vadd.f32 %v2128_v51, %v737_v46  ;;  %v743_v44 = vld [vmem:[#allocation5 + $0x48] sm:$0xff] }
 0x20f   : > { %721 = vst [vmem:[#allocation4 + $0x18] sm:$0xff] %v705_v52  ;;  %882 = vst [vmem:[#allocation5 + $0x18] sm:$0xff] %v866_v53  ;;  %v2065_v54 = vpop.f32.mrb[8].mxu0  ;;  %v2129_v55 = vpop.f32.mrb[8].mxu1 }
 0x210   : > { %v2066_v56 = vpop.f32.mrb[9].mxu0  ;;  %v2130_v58 = vpop.f32.mrb[9].mxu1 }
 0x211   : > { %v2067_v23 = vadd.f32 %v2066_v56, %v2065_v54  ;;  %v2131_v59 = vadd.f32 %v2130_v58, %v2129_v55  ;;  %v2068_v60 = vpop.f32.mrb[10].mxu0  ;;  %v2132_v61 = vpop.f32.mrb[10].mxu1  ;;  %v551_v54 = vld [vmem:[#allocation4 + $0x50] sm:$0xff] }
 0x212   : > { %v2069_v34 = vpop.f32.mrb[11].mxu0  ;;  %v2133_v0 = vpop.f32.mrb[11].mxu1 }
 0x213   : > { %v706_v3 = vadd.f32 %v2067_v23, %v545_v10  ;;  %v867_v4 = vadd.f32 %v2131_v59, %v738_v57  ;;  %v2070_v5 = vadd.f32 %v2069_v34, %v2068_v60  ;;  %v2134_v6 = vadd.f32 %v2133_v0, %v2132_v61  ;;  %v744_v10 = vld [vmem:[#allocation5 + $0x50] sm:$0xff]  ;;  %v552_v60 = vld [vmem:[#allocation4 + $0x58] sm:$0xff] }
 0x215   : > { %722 = vst [vmem:[#allocation4 + $0x20] sm:$0xff] %v706_v3  ;;  %883 = vst [vmem:[#allocation5 + $0x20] sm:$0xff] %v867_v4  ;;  %v707_v7 = vadd.f32 %v2070_v5, %v546_v62  ;;  %v868_v8 = vadd.f32 %v2134_v6, %v739_v63  ;;  %v745_v62 = vld [vmem:[#allocation5 + $0x58] sm:$0xff] }
 0x217   : > { %723 = vst [vmem:[#allocation4 + $0x28] sm:$0xff] %v707_v7  ;;  %884 = vst [vmem:[#allocation5 + $0x28] sm:$0xff] %v868_v8  ;;  %v2071_v9 = vpop.f32.mrb[12].mxu0  ;;  %v2135_v11 = vpop.f32.mrb[12].mxu1 }
 0x218   : > { %v2072_v13 = vpop.f32.mrb[13].mxu0  ;;  %v2136_v15 = vpop.f32.mrb[13].mxu1 }
 0x219   : > { %v2073_v16 = vadd.f32 %v2072_v13, %v2071_v9  ;;  %v2137_v17 = vadd.f32 %v2136_v15, %v2135_v11  ;;  %v2074_v18 = vpop.f32.mrb[14].mxu0  ;;  %v2138_v19 = vpop.f32.mrb[14].mxu1  ;;  %v553_v9 = vld [vmem:[#allocation4 + $0x60] sm:$0xff] }
 0x21a   : > { %v2075_v21 = vpop.f32.mrb[15].mxu0  ;;  %v2139_v24 = vpop.f32.mrb[15].mxu1 }
 0x21b   : > { %v708_v25 = vadd.f32 %v2073_v16, %v547_v12  ;;  %v869_v26 = vadd.f32 %v2137_v17, %v740_v14  ;;  %v2076_v27 = vadd.f32 %v2075_v21, %v2074_v18  ;;  %v2140_v28 = vadd.f32 %v2139_v24, %v2138_v19  ;;  %v746_v12 = vld [vmem:[#allocation5 + $0x60] sm:$0xff]  ;;  %v554_v18 = vld [vmem:[#allocation4 + $0x68] sm:$0xff] }
 0x21d   : > { %724 = vst [vmem:[#allocation4 + $0x30] sm:$0xff] %v708_v25  ;;  %885 = vst [vmem:[#allocation5 + $0x30] sm:$0xff] %v869_v26  ;;  %v709_v29 = vadd.f32 %v2076_v27, %v548_v20  ;;  %v870_v30 = vadd.f32 %v2140_v28, %v741_v22  ;;  %v747_v20 = vld [vmem:[#allocation5 + $0x68] sm:$0xff] }
 0x21f   : > { %725 = vst [vmem:[#allocation4 + $0x38] sm:$0xff] %v709_v29  ;;  %886 = vst [vmem:[#allocation5 + $0x38] sm:$0xff] %v870_v30  ;;  %v2077_v31 = vpop.f32.mrb[16].mxu0  ;;  %v2141_v32 = vpop.f32.mrb[16].mxu1 }
 0x220   : > { %v2078_v35 = vpop.f32.mrb[17].mxu0  ;;  %v2142_v37 = vpop.f32.mrb[17].mxu1 }
 0x221   : > { %v2079_v38 = vadd.f32 %v2078_v35, %v2077_v31  ;;  %v2143_v39 = vadd.f32 %v2142_v37, %v2141_v32  ;;  %v2080_v40 = vpop.f32.mrb[18].mxu0  ;;  %v2144_v41 = vpop.f32.mrb[18].mxu1  ;;  %v555_v31 = vld [vmem:[#allocation4 + $0x70] sm:$0xff] }
 0x222   : > { %v2081_v43 = vpop.f32.mrb[19].mxu0  ;;  %v2145_v45 = vpop.f32.mrb[19].mxu1 }
 0x223   : > { %v710_v46 = vadd.f32 %v2079_v38, %v549_v33  ;;  %v871_v47 = vadd.f32 %v2143_v39, %v742_v36  ;;  %v2082_v48 = vadd.f32 %v2081_v43, %v2080_v40  ;;  %v2146_v49 = vadd.f32 %v2145_v45, %v2144_v41  ;;  %v748_v33 = vld [vmem:[#allocation5 + $0x70] sm:$0xff]  ;;  %v556_v40 = vld [vmem:[#allocation4 + $0x78] sm:$0xff] }
 0x225   : > { %726 = vst [vmem:[#allocation4 + $0x40] sm:$0xff] %v710_v46  ;;  %887 = vst [vmem:[#allocation5 + $0x40] sm:$0xff] %v871_v47  ;;  %v711_v50 = vadd.f32 %v2082_v48, %v550_v42  ;;  %v872_v51 = vadd.f32 %v2146_v49, %v743_v44  ;;  %v749_v42 = vld [vmem:[#allocation5 + $0x78] sm:$0xff] }
 0x227   : > { %727 = vst [vmem:[#allocation4 + $0x48] sm:$0xff] %v711_v50  ;;  %888 = vst [vmem:[#allocation5 + $0x48] sm:$0xff] %v872_v51  ;;  %v2083_v52 = vpop.f32.mrb[20].mxu0  ;;  %v2147_v53 = vpop.f32.mrb[20].mxu1 }
 0x228   : > { %v2084_v55 = vpop.f32.mrb[21].mxu0  ;;  %v2148_v56 = vpop.f32.mrb[21].mxu1 }
 0x229   : > { %v2085_v57 = vadd.f32 %v2084_v55, %v2083_v52  ;;  %v2149_v58 = vadd.f32 %v2148_v56, %v2147_v53  ;;  %v2086_v23 = vpop.f32.mrb[22].mxu0  ;;  %v2150_v59 = vpop.f32.mrb[22].mxu1 }
 0x22a   : > { %v2087_v61 = vpop.f32.mrb[23].mxu0  ;;  %v2151_v34 = vpop.f32.mrb[23].mxu1 }
 0x22b   : > { %v712_v63 = vadd.f32 %v2085_v57, %v551_v54  ;;  %v873_v0 = vadd.f32 %v2149_v58, %v744_v10  ;;  %v2088_v3 = vadd.f32 %v2087_v61, %v2086_v23  ;;  %v2152_v4 = vadd.f32 %v2151_v34, %v2150_v59 }
 0x22d   : > { %728 = vst [vmem:[#allocation4 + $0x50] sm:$0xff] %v712_v63  ;;  %889 = vst [vmem:[#allocation5 + $0x50] sm:$0xff] %v873_v0  ;;  %v713_v5 = vadd.f32 %v2088_v3, %v552_v60  ;;  %v874_v6 = vadd.f32 %v2152_v4, %v745_v62 }
 0x22f   : > { %729 = vst [vmem:[#allocation4 + $0x58] sm:$0xff] %v713_v5  ;;  %890 = vst [vmem:[#allocation5 + $0x58] sm:$0xff] %v874_v6  ;;  %v2089_v7 = vpop.f32.mrb[24].mxu0  ;;  %v2153_v8 = vpop.f32.mrb[24].mxu1 }
 0x230   : > { %v2090_v11 = vpop.f32.mrb[25].mxu0  ;;  %v2154_v13 = vpop.f32.mrb[25].mxu1 }
 0x231   : > { %v2091_v14 = vadd.f32 %v2090_v11, %v2089_v7  ;;  %v2155_v15 = vadd.f32 %v2154_v13, %v2153_v8  ;;  %v2092_v16 = vpop.f32.mrb[26].mxu0  ;;  %v2156_v17 = vpop.f32.mrb[26].mxu1 }
 0x232   : > { %v2093_v19 = vpop.f32.mrb[27].mxu0  ;;  %v2157_v21 = vpop.f32.mrb[27].mxu1 }
 0x233   : > { %v714_v22 = vadd.f32 %v2091_v14, %v553_v9  ;;  %v875_v24 = vadd.f32 %v2155_v15, %v746_v12  ;;  %v2094_v25 = vadd.f32 %v2093_v19, %v2092_v16  ;;  %v2158_v26 = vadd.f32 %v2157_v21, %v2156_v17 }
 0x235   : > { %730 = vst [vmem:[#allocation4 + $0x60] sm:$0xff] %v714_v22  ;;  %891 = vst [vmem:[#allocation5 + $0x60] sm:$0xff] %v875_v24  ;;  %v715_v27 = vadd.f32 %v2094_v25, %v554_v18  ;;  %v876_v28 = vadd.f32 %v2158_v26, %v747_v20 }
 0x237   : > { %731 = vst [vmem:[#allocation4 + $0x68] sm:$0xff] %v715_v27  ;;  %892 = vst [vmem:[#allocation5 + $0x68] sm:$0xff] %v876_v28  ;;  %v2095_v29 = vpop.f32.mrb[28].mxu0  ;;  %v2159_v30 = vpop.f32.mrb[28].mxu1 }
 0x238   : > { %v2096_v32 = vpop.f32.mrb[29].mxu0  ;;  %v2160_v35 = vpop.f32.mrb[29].mxu1 }
 0x239   : > { %v2097_v36 = vadd.f32 %v2096_v32, %v2095_v29  ;;  %v2161_v37 = vadd.f32 %v2160_v35, %v2159_v30  ;;  %v2098_v38 = vpop.f32.mrb[30].mxu0  ;;  %v2162_v39 = vpop.f32.mrb[30].mxu1 }
 0x23a   : > { %v2099_v41 = vpop.f32.mrb[31].mxu0  ;;  %v2163_v43 = vpop.f32.mrb[31].mxu1 }
 0x23b   : > { %v716_v44 = vadd.f32 %v2097_v36, %v555_v31  ;;  %v877_v45 = vadd.f32 %v2161_v37, %v748_v33  ;;  %v2100_v46 = vadd.f32 %v2099_v41, %v2098_v38  ;;  %v2164_v47 = vadd.f32 %v2163_v43, %v2162_v39 }
 0x23d   : > { %732 = vst [vmem:[#allocation4 + $0x70] sm:$0xff] %v716_v44  ;;  %893 = vst [vmem:[#allocation5 + $0x70] sm:$0xff] %v877_v45  ;;  %v717_v48 = vadd.f32 %v2100_v46, %v556_v40  ;;  %v878_v49 = vadd.f32 %v2164_v47, %v749_v42 }
 0x23f   : > { %733 = vst [vmem:[#allocation4 + $0x78] sm:$0xff] %v717_v48  ;;  %894 = vst [vmem:[#allocation5 + $0x78] sm:$0xff] %v878_v49 }
 0x240 PF: > { %v927_v50 = vlaneseq  ;;  %v2450_v51 = vld [vmem:[#allocation16] sm:$0xff]   ;;  %2267 = vmatprep.subr.bf16.mxu1 %v2848_v2  ;;  %v930_v52 = vstv %s3125_s17  ;;  %v2451_v53 = vld [vmem:[#allocation16 + $0x8] sm:$0xff]   ;;  %s944_s15 = sshra.s32 %s3125_s17, 3  ;;  %v2452_v55 = vld [vmem:[#allocation16 + $0x10] sm:$0xff]   ;;  %vm2850_vm2 = vmmov 0   ;;  %vm1141_vm4 = vcmask 130048  }
 0x241   : > { %2217 = vmatprep.subr.bf16.mxu0 %v2450_v51  ;;  %s3280_s18 = sshll.u32 %s944_s15, 2  ;;  %v2453_v59 = vld [vmem:[#allocation16 + $0x18] sm:$0xff]   ;;  %v895_v60 = vld [vmem:[#allocation4] sm:$0xff]  ;;  %v2454_v0 = vld [vmem:[#allocation16 + $0x20] sm:$0xff]   ;;  %2283 = vmatprep.mubr.msk.bf16.mxu1 %vm2850_vm2, %v2848_v2  ;;  %v2851_v31 = vmov 1.0|1.0  }
 0x242   : > { %v928_v54 = vshrl.u32 %v927_v50, 7  ;;  %2218 = vmatpush3.bf16.msra.mxu0 %v2450_v51  ;;  %v896_v61 = vld [vmem:[#allocation4 + $0x8] sm:$0xff]  ;;  %s947_s21 = scalar_lea.vmem [#allocation13], %s3280_s18  ;;  %v897_v3 = vld [vmem:[#allocation4 + $0x10] sm:$0xff]  ;;  %v898_v4 = vld [vmem:[#allocation4 + $0x18] sm:$0xff]  ;;  %s2036_s23 = smul.u32 12, %s944_s15 }
 0x243   : > { %2219 = vmatprep.subr.bf16.mxu0 %v2451_v53  ;;  %v950_v34 = vpack.c.bf16 %v896_v61, %v895_v60  ;;  %v2455_v5 = vld [vmem:[#allocation16 + $0x28] sm:$0xff]   ;;  %v899_v6 = vld [vmem:[#allocation4 + $0x20] sm:$0xff]  ;;  %v900_v7 = vld [vmem:[#allocation4 + $0x28] sm:$0xff]  ;;  %v951_v8 = vpack.c.bf16 %v898_v4, %v897_v3  ;;  %v2852_v60 = vmov 0   ;;  %s1770_s25 = sshra.s32 %s3125_s17, 4  ;;  %s2853_s22 = smov [#allocation18]  }
 0x244   : > { %v929_v10 = vadd.s32 8, %v928_v54  ;;  %v3276_v56 = vadd.s32 %v930_v52, %v928_v54  ;;  %v935_v57 = vsub.s32 1, %v928_v54  ;;  %v2456_v9 = vld [vmem:[#allocation16 + $0x30] sm:$0xff]   ;;  %v901_v11 = vld [vmem:[#allocation4 + $0x30] sm:$0xff]  ;;  %v902_v12 = vld [vmem:[#allocation4 + $0x38] sm:$0xff]  ;;  %v952_v13 = vpack.c.bf16 %v900_v7, %v899_v6  ;;  %s1467_s14 = scalar_lea.vmem [#allocation11], %s2036_s23 }
 0x245   : > { %2233 = vmatprep.mubr.bf16.mxu0 %v950_v34  ;;  %2268 = vmatpush3.bf16.msra.mxu1 %v950_v34  ;;  %v2457_v14 = vld [vmem:[#allocation16 + $0x38] sm:$0xff]   ;;  %v903_v15 = vld [vmem:[#allocation4 + $0x40] sm:$0xff]  ;;  %v953_v17 = vpack.c.bf16 %v902_v12, %v901_v11  ;;  %v905_v20 = vld [vmem:[#allocation4 + $0x50] sm:$0xff]  ;;  %s1798_s26 = sshll.u32 %s2853_s22, 4  ;;  %s3362_s19 = sshll.u32 %s1770_s25, 3  ;;  %s1799_s26 = int_to_ptr.vmem [resolvable:$true] %s1798_s26 }
 0x246   : > { %v3282_v58 = vadd.s32 %v930_v52, %v929_v10  ;;  %v3285_v23 = vrot.slane %v3131_v1, %v935_v57  ;;  %2220 = vmatpush3.bf16.msra.mxu0 %v2451_v53  ;;  %2269 = vmatprep.subr.bf16.mxu1 %v2848_v2  ;;  %v904_v16 = vld [vmem:[#allocation4 + $0x48] sm:$0xff]  ;;  %v2458_v19 = vld [vmem:[%s947_s21] sm:$0xff]   ;;  %v906_v21 = vld [vmem:[#allocation4 + $0x58] sm:$0xff]  ;;  %p2395_p5 = scmp.eq.s32.totalorder %s2930_s16, 2  ;;  %s1766_s20 = scalar_lea.vmem [#allocation18], %s3125_s17 }
 0x247   : > { %2221 = vmatprep.subr.bf16.mxu0 %v2452_v55  ;;  %v954_v18 = vpack.c.bf16 %v904_v16, %v903_v15  ;;  %v955_v22 = vpack.c.bf16 %v906_v21, %v905_v20  ;;  %v907_v24 = vld [vmem:[#allocation4 + $0x60] sm:$0xff]  ;;  %v908_v25 = vld [vmem:[#allocation4 + $0x68] sm:$0xff]  ;;  %v909_v27 = vld [vmem:[#allocation4 + $0x70] sm:$0xff]  ;;  %s2731_s27 = scalar_lea.vmem %s1799_s26, 4096  ;;  %p2738_p1 = scmp.lt.s32.totalorder %s1799_s26, %s1799_s26 }
 0x248   : > { %vm937_vm0 = vcmp.eq.s32.totalorder %v3285_v23, %v3276_v56  ;;  %vm938_vm1 = vcmp.eq.s32.totalorder %v3285_v23, %v3282_v58  ;;  %v956_v26 = vpack.c.bf16 %v908_v25, %v907_v24  ;;  %v910_v28 = vld [vmem:[#allocation4 + $0x78] sm:$0xff]  ;;  %v2461_v42 = vld [vmem:[#allocation14 + $0x4] ss:$12 sps:$4 sm:$0xff]   ;;  %v2467_v46 = vld [vmem:[#allocation14 + $0x34] ss:$12 sps:$4 sm:$0xff]   ;;  %p2732_p8 = scmp.ne.s32.totalorder %s1799_s26, %s2731_s27  ;;  %p2739_p4 = scmp.lt.s32.totalorder %s2731_s27, %s2731_s27 }
 0x249   : > { %v1959_v62 = vsel %vm937_vm0, 1.0, %v2848_v2  ;;  %v1960_v1 = vsel %vm938_vm1, 1.0, %v2848_v2  ;;  %2270 = vmatpush3.bf16.msra.mxu1 %v951_v8  ;;  %v957_v29 = vpack.c.bf16 %v910_v28, %v909_v27  ;;  %vm3317_vm3 = vmpackc.low %vm938_vm1, %vm937_vm0  ;;  %v2459_v41 = vld [vmem:[#allocation14] ss:$12 sps:$4 sm:$0xff]   ;;  %v2462_v43 = vld [vmem:[#allocation14 + $0x18] ss:$12 sps:$4 sm:$0xff]  }
 0x24a   : > { %v943_v63 = vpack.c.bf16 %v1960_v1, %v1959_v62  ;;  %2222 = vmatpush3.bf16.msra.mxu0 %v2452_v55  ;;  %2271 = vmatprep.subr.bf16.mxu1 %v2848_v2  ;;  %v2464_v44 = vld [vmem:[#allocation14 + $0x1c] ss:$12 sps:$4 sm:$0xff]   ;;  %v2470_v48 = vld [vmem:[#allocation14 + $0x4c] ss:$12 sps:$4 sm:$0xff]   ;;  %v2473_v50 = vld [vmem:[#allocation14 + $0x64] ss:$12 sps:$4 sm:$0xff]   ;;  %p2733_p12 = pnand %p2732_p8, %p2395_p5  ;;  %p2740_p7 = por %p2739_p4, %p2738_p1 }
 0x24b   : > { %2223 = vmatprep.subr.bf16.mxu0 %v2453_v59  ;;  %v2465_v45 = vld [vmem:[#allocation14 + $0x30] ss:$12 sps:$4 sm:$0xff]   ;;  %v2468_v47 = vld [vmem:[#allocation14 + $0x48] ss:$12 sps:$4 sm:$0xff]   ;;  %v2471_v49 = vld [vmem:[#allocation14 + $0x60] ss:$12 sps:$4 sm:$0xff]  }
 0x24c   : > { %1119 = vxpose.xlu0.c.b16.start.end [1/1] (short) %v943_v63, 128  ;;  %v2476_v51 = vld [vmem:[#allocation14 + $0x7c] ss:$12 sps:$4 sm:$0xff]   ;;  %v2474_v52 = vld [vmem:[#allocation14 + $0x78] ss:$12 sps:$4 sm:$0xff]   ;;  %v2480_v54 = vld [vmem:[#allocation14 + $0x94] ss:$12 sps:$4 sm:$0xff]   ;;  %p2734_p13 = pneg %p2733_p12 }
 0x24d   : > { %2272 = vmatpush3.bf16.msra.mxu1 %v952_v13  ;;  %v2478_v53 = vld [vmem:[#allocation14 + $0x90] ss:$12 sps:$4 sm:$0xff]   ;;  %v2482_v10 = vld [vmem:[#allocation14 + $0xa8] ss:$12 sps:$4 sm:$0xff]   ;;  %v2484_v56 = vld [vmem:[#allocation14 + $0xac] ss:$12 sps:$4 sm:$0xff]  }
 0x24e   : > { %2224 = vmatpush3.bf16.msra.mxu0 %v2453_v59  ;;  %2273 = vmatprep.subr.bf16.mxu1 %v2848_v2  ;;  %v2488_v30 = vld [vmem:[#allocation14 + $0x80] ss:$12 sps:$4 sm:$0xff]   ;;  %p2741_p0 = pnand %p2740_p7, %p2734_p13 }
 0x24f   : > { %2225 = vmatprep.subr.bf16.mxu0 %v2454_v0 }
 0x251   : > { %2274 = vmatpush3.bf16.msra.mxu1 %v953_v17 }
 0x252   : > { %2226 = vmatpush3.bf16.msra.mxu0 %v2454_v0  ;;  %2275 = vmatprep.subr.bf16.mxu1 %v2848_v2 }
 0x253   : > { %2227 = vmatprep.subr.bf16.mxu0 %v2455_v5 }
 0x255   : > { %2276 = vmatpush3.bf16.msra.mxu1 %v954_v18 }
 0x256   : > { %2228 = vmatpush3.bf16.msra.mxu0 %v2455_v5  ;;  %2277 = vmatprep.subr.bf16.mxu1 %v2848_v2 }
 0x257   : > { %2229 = vmatprep.subr.bf16.mxu0 %v2456_v9 }
 0x259   : > { %2278 = vmatpush3.bf16.msra.mxu1 %v955_v22 }
 0x25a   : > { %2230 = vmatpush3.bf16.msra.mxu0 %v2456_v9  ;;  %2279 = vmatprep.subr.bf16.mxu1 %v2848_v2 }
 0x25b   : > { %2231 = vmatprep.subr.bf16.mxu0 %v2457_v14 }
 0x25d   : > { %2280 = vmatpush3.bf16.msra.mxu1 %v956_v26 }
 0x25e   : > { %2232 = vmatpush3.bf16.msra.mxu0 %v2457_v14  ;;  %2281 = vmatprep.subr.bf16.mxu1 %v2848_v2 }
 0x25f   : > { %2249 = vmatprep.subr.bf16.mxu0 %v2458_v19 }
 0x261   : > { %2234 = vmatmul.mubr.bf16.vlgmr.msra.gmra.mrb[0].mxu0 %v951_v8  ;;  %2282 = vmatpush3.bf16.msra.mxu1 %v957_v29 }
 0x262   : > { %2250 = vmatpush3.bf16.msra.mxu0 %v2458_v19  ;;  %2237 = vmatprep.mubr.bf16.mxu0 %v952_v13 }
 0x263   : > { %2287 = vmatprep.subr.bf16.mxu1 %v2848_v2  ;;  %1639 = vmatprep.subr.bf16.mxu0 %v2461_v42 }
 0x264   : > { %2284 = vmatmul.mubr.msk.bf16.vlgmr.msra.gmra.mrb[0].mxu1 %vm3317_vm3, %v2851_v31 }
 0x265   : > { %2303 = vmatprep.mubr.msk.bf16.mxu1 %vm2850_vm2, %v2848_v2 }
 0x269   : > { %2238 = vmatmul.mubr.bf16.gmra.mrb[4].mxu0 %v953_v17 }
 0x26a   : > { %2241 = vmatprep.mubr.bf16.mxu0 %v954_v18 }
 0x271   : > { %2242 = vmatmul.mubr.bf16.gmra.mrb[8].mxu0 %v955_v22 }
 0x272   : > { %2245 = vmatprep.mubr.bf16.mxu0 %v956_v26 }
 0x279   : > { %2246 = vmatmul.mubr.bf16.gmra.mrb[12].mxu0 %v957_v29 }
 0x2b2   : > { %v1127_v32 = vpop.trf.xlu0 }
 0x2b3   : > { %2251 = vmatprep.mubr.msk.bf16.mxu0 %vm1141_vm4, %v1127_v32 }
 0x2b6   : > { %v1128_v33 = vpop.trf.xlu0 }
 0x2b7   : > { %2252 = vmatmul.mubr.msk.bf16.vlgmr.msra.gmra.mrb[0].mxu0 %vm1141_vm4, %v1128_v33 }
 0x2b8   : > { %1640 = vmatpush1.bf16.msra.mxu0 %v2459_v41 }
 0x2b9   : > { %1641 = vmatprep.subr.bf16.mxu0 %v2464_v44 }
 0x2ba   : > { %v1129_v35 = vpop.trf.xlu0 }
 0x2bb   : > { %2255 = vmatprep.mubr.msk.bf16.mxu0 %vm1141_vm4, %v1129_v35 }
 0x2bc   : > { %1642 = vmatpush1.bf16.msra.mxu0 %v2462_v43 }
 0x2bd   : > { %1643 = vmatprep.subr.bf16.mxu0 %v2467_v46 }
 0x2be   : > { %v1130_v36 = vpop.trf.xlu0 }
 0x2bf   : > { %2256 = vmatmul.mubr.msk.bf16.gmra.mrb[4].mxu0 %vm1141_vm4, %v1130_v36 }
 0x2c0   : > { %1644 = vmatpush1.bf16.msra.mxu0 %v2465_v45 }
 0x2c1   : > { %1645 = vmatprep.subr.bf16.mxu0 %v2470_v48  ;;  %v913_v48 = vld [vmem:[#allocation5 + $0x10] sm:$0xff] }
 0x2c2   : > { %v1131_v37 = vpop.trf.xlu0 }
 0x2c3   : > { %2259 = vmatprep.mubr.msk.bf16.mxu0 %vm1141_vm4, %v1131_v37 }
 0x2c4   : > { %1646 = vmatpush1.bf16.msra.mxu0 %v2468_v47 }
 0x2c5   : > { %1647 = vmatprep.subr.bf16.mxu0 %v2473_v50 }
 0x2c6   : > { %v1132_v38 = vpop.trf.xlu0 }
 0x2c7   : > { %2260 = vmatmul.mubr.msk.bf16.gmra.mrb[8].mxu0 %vm1141_vm4, %v1132_v38 }
 0x2c8   : > { %1648 = vmatpush1.bf16.msra.mxu0 %v2471_v49  ;;  %v914_v49 = vld [vmem:[#allocation5 + $0x18] sm:$0xff] }
 0x2c9   : > { %1649 = vmatprep.subr.bf16.mxu0 %v2476_v51 }
 0x2ca   : > { %v1133_v39 = vpop.trf.xlu0 }
 0x2cb   : > { %2263 = vmatprep.mubr.msk.bf16.mxu0 %vm1141_vm4, %v1133_v39 }
 0x2cc   : > { %1650 = vmatpush1.bf16.msra.mxu0 %v2474_v52 }
 0x2cd   : > { %1651 = vmatprep.subr.bf16.mxu0 %v2480_v54  ;;  %v912_v54 = vld [vmem:[#allocation5 + $0x8] sm:$0xff] }
 0x2ce   : > { %v1134_v40 = vpop.trf.xlu0 }
 0x2cf   : > { %2264 = vmatmul.mubr.msk.bf16.gmra.mrb[12].mxu0 %vm1141_vm4, %v1134_v40 }
 0x2d0   : > { %1652 = vmatpush1.bf16.msra.mxu0 %v2478_v53  ;;  %1671 = vmatprep.mubr.bf16.mxu0 %v2852_v60  ;;  %v911_v53 = vld [vmem:[#allocation5] sm:$0xff] }
 0x2d1   : > { %1653 = vmatprep.subr.bf16.mxu0 %v2484_v56 }
 0x2d4   : > { %1654 = vmatpush1.bf16.msra.mxu0 %v2482_v10 }
 0x337   : > { %v1417_v55 = vpop.f32.mrb[0].mxu1 }
 0x338   : > { %v2285_v57 = vpop.f32.mrb[1].mxu1 }
 0x339   : > { %v1420_v58 = vpop.f32.mrb[2].mxu1 }
 0x33a   : > { %v3335_v23 = vpack.c.bf16 %v1420_v58, %v1417_v55  ;;  %v2286_v59 = vpop.f32.mrb[3].mxu1 }
 0x33c   : > { %1672 = vmatmul.mubr.bf16.vlgmr.msra.gmra.mrb[16].mxu0 %v3335_v23 }
 0x38a   : > { %v2253_v61 = vpop.f32.mrb[0].mxu0 }
 0x38b   : > { %v1981_v62 = vmul.f32 -1.442695, %v2253_v61  ;;  %v1200_v1 = vpop.f32.mrb[1].mxu0 }
 0x38c   : > { %v1979_v34 = vmul.f32 -1.442695, %v1200_v1  ;;  %v2254_v63 = vpop.f32.mrb[2].mxu0 }
 0x38d   : > { %2491 = vpow2.f32 %v1981_v62  ;;  %v1982_v0 = vmul.f32 -1.442695, %v2254_v63  ;;  %v1203_v3 = vpop.f32.mrb[3].mxu0 }
 0x38e   : > { %2493 = vpow2.f32 %v1979_v34  ;;  %v1980_v4 = vmul.f32 -1.442695, %v1203_v3 }
 0x38f   : > { %2495 = vpow2.f32 %v1982_v0 }
 0x390   : > { %2497 = vpow2.f32 %v1980_v4 }
 0x392   : > { %v2257_v5 = vpop.f32.mrb[4].mxu0 }
 0x393   : > { %v1985_v6 = vmul.f32 -1.442695, %v2257_v5  ;;  %v1216_v7 = vpop.f32.mrb[5].mxu0 }
 0x394   : > { %v1983_v8 = vmul.f32 -1.442695, %v1216_v7  ;;  %v2258_v9 = vpop.f32.mrb[6].mxu0 }
 0x395   : > { %2499 = vpow2.f32 %v1985_v6  ;;  %v1986_v11 = vmul.f32 -1.442695, %v2258_v9  ;;  %v1219_v12 = vpop.f32.mrb[7].mxu0  ;;  %v918_v9 = vld [vmem:[#allocation5 + $0x38] sm:$0xff] }
 0x396   : > { %2501 = vpow2.f32 %v1983_v8  ;;  %v1984_v13 = vmul.f32 -1.442695, %v1219_v12  ;;  %v917_v8 = vld [vmem:[#allocation5 + $0x30] sm:$0xff]  ;;  %v915_v12 = vld [vmem:[#allocation5 + $0x20] sm:$0xff] }
 0x397   : > { %v2492_v14 = vpop.eup %2491  ;;  %2503 = vpow2.f32 %v1986_v11 }
 0x398   : > { %v2494_v15 = vpop.eup %2493  ;;  %v1313_v16 = vadd.f32 1.0, %v2492_v14  ;;  %2505 = vpow2.f32 %v1984_v13  ;;  %v916_v13 = vld [vmem:[#allocation5 + $0x28] sm:$0xff] }
 0x399   : > { %v2496_v17 = vpop.eup %2495  ;;  %v1311_v18 = vadd.f32 1.0, %v2494_v15 }
 0x39a   : > { %v2498_v19 = vpop.eup %2497  ;;  %2507 = vrcp.f32 %v1313_v16  ;;  %v1314_v20 = vadd.f32 1.0, %v2496_v17  ;;  %v2261_v21 = vpop.f32.mrb[8].mxu0 }
 0x39b   : > { %2509 = vrcp.f32 %v1311_v18  ;;  %v1312_v22 = vadd.f32 1.0, %v2498_v19  ;;  %v1989_v24 = vmul.f32 -1.442695, %v2261_v21  ;;  %v1232_v25 = vpop.f32.mrb[9].mxu0 }
 0x39c   : > { %2511 = vrcp.f32 %v1314_v20  ;;  %v1987_v26 = vmul.f32 -1.442695, %v1232_v25  ;;  %v2262_v27 = vpop.f32.mrb[10].mxu0 }
 0x39d   : > { %2513 = vrcp.f32 %v1312_v22  ;;  %v1990_v28 = vmul.f32 -1.442695, %v2262_v27  ;;  %v1235_v29 = vpop.f32.mrb[11].mxu0 }
 0x39e   : > { %2515 = vpow2.f32 %v1989_v24  ;;  %v1988_v32 = vmul.f32 -1.442695, %v1235_v29 }
 0x39f   : > { %v2500_v33 = vpop.eup %2499  ;;  %2517 = vpow2.f32 %v1987_v26 }
 0x3a0   : > { %v2502_v35 = vpop.eup %2501  ;;  %v1317_v36 = vadd.f32 1.0, %v2500_v33  ;;  %2519 = vpow2.f32 %v1990_v28 }
 0x3a1   : > { %v2504_v37 = vpop.eup %2503  ;;  %v1315_v38 = vadd.f32 1.0, %v2502_v35  ;;  %2521 = vpow2.f32 %v1988_v32  ;;  %v921_v35 = vld [vmem:[#allocation5 + $0x50] sm:$0xff] }
 0x3a2   : > { %v2506_v39 = vpop.eup %2505  ;;  %2523 = vrcp.f32 %v1317_v36  ;;  %v1318_v40 = vadd.f32 1.0, %v2504_v37  ;;  %v2265_v41 = vpop.f32.mrb[12].mxu0  ;;  %v922_v36 = vld [vmem:[#allocation5 + $0x58] sm:$0xff] }
 0x3a3   : > { %2525 = vrcp.f32 %v1315_v38  ;;  %v1316_v42 = vadd.f32 1.0, %v2506_v39  ;;  %v1993_v43 = vmul.f32 -1.442695, %v2265_v41  ;;  %v1248_v44 = vpop.f32.mrb[13].mxu0  ;;  %v919_v38 = vld [vmem:[#allocation5 + $0x40] sm:$0xff]  ;;  %v920_v39 = vld [vmem:[#allocation5 + $0x48] sm:$0xff] }
 0x3a4   : > { %v2508_v45 = vpop.eup %2507  ;;  %2527 = vrcp.f32 %v1318_v40  ;;  %v1991_v46 = vmul.f32 -1.442695, %v1248_v44  ;;  %v2266_v47 = vpop.f32.mrb[14].mxu0 }
 0x3a5   : > { %v2510_v50 = vpop.eup %2509  ;;  %2529 = vrcp.f32 %v1316_v42  ;;  %v1994_v51 = vmul.f32 -1.442695, %v2266_v47  ;;  %v1251_v52 = vpop.f32.mrb[15].mxu0  ;;  %v1361_v57 = vmul.f32 %v2508_v45, %v913_v48 }
 0x3a6   : > { %v2512_v55 = vpop.eup %2511  ;;  %2531 = vpow2.f32 %v1993_v43  ;;  %v1992_v10 = vmul.f32 -1.442695, %v1251_v52  ;;  %v1359_v60 = vmul.f32 %v2510_v50, %v911_v53  ;;  %v926_v50 = vld [vmem:[#allocation5 + $0x78] sm:$0xff]  ;;  %v923_v52 = vld [vmem:[#allocation5 + $0x60] sm:$0xff]  ;;  %v924_v53 = vld [vmem:[#allocation5 + $0x68] sm:$0xff] }
 0x3a7   : > { %v2514_v56 = vpop.eup %2513  ;;  %2533 = vpow2.f32 %v1991_v46  ;;  %v1362_v58 = vmul.f32 %v2512_v55, %v914_v49  ;;  %v925_v49 = vld [vmem:[#allocation5 + $0x70] sm:$0xff] }
 0x3a8   : > { %v2516_v59 = vpop.eup %2515  ;;  %2535 = vpow2.f32 %v1994_v51  ;;  %v1360_v61 = vmul.f32 %v2514_v56, %v912_v54 }
 0x3a9   : > { %v2518_v62 = vpop.eup %2517  ;;  %v1321_v1 = vadd.f32 1.0, %v2516_v59  ;;  %2537 = vpow2.f32 %v1992_v10  ;;  %v1376_v34 = vpack.c.bf16 %v1362_v58, %v1361_v57 }
 0x3aa   : > { %v2520_v63 = vpop.eup %2519  ;;  %v1319_v0 = vadd.f32 1.0, %v2518_v62  ;;  %v1375_v3 = vpack.c.bf16 %v1360_v61, %v1359_v60  ;;  %v2477_v61 = vld [vmem:[#allocation14 + $0x8] ss:$12 sps:$4 sm:$0xff]   ;;  %v2481_v62 = vld [vmem:[#allocation14 + $0x20] ss:$12 sps:$4 sm:$0xff]  }
 0x3ab   : > { %v2522_v4 = vpop.eup %2521  ;;  %2539 = vrcp.f32 %v1321_v1  ;;  %v1322_v5 = vadd.f32 1.0, %v2520_v63  ;;  %v2485_v1 = vld [vmem:[#allocation14 + $0x38] ss:$12 sps:$4 sm:$0xff]   ;;  %v2487_v63 = vld [vmem:[#allocation14 + $0x68] ss:$12 sps:$4 sm:$0xff]  }
 0x3ac   : > { %v2524_v6 = vpop.eup %2523  ;;  %2541 = vrcp.f32 %v1319_v0  ;;  %v1320_v7 = vadd.f32 1.0, %v2522_v4  ;;  %2288 = vmatpush3.bf16.msra.mxu1 %v1375_v3  ;;  %v2490_v0 = vld [vmem:[#allocation14 + $0xb0] ss:$12 sps:$4 sm:$0xff]  }
 0x3ad   : > { %v2526_v11 = vpop.eup %2525  ;;  %2543 = vrcp.f32 %v1322_v5  ;;  %2289 = vmatprep.subr.bf16.mxu1 %v2848_v2  ;;  %v1365_v16 = vmul.f32 %v2524_v6, %v917_v8 }
 0x3ae   : > { %v2528_v14 = vpop.eup %2527  ;;  %2545 = vrcp.f32 %v1320_v7  ;;  %v1363_v19 = vmul.f32 %v2526_v11, %v915_v12  ;;  %v1468_v11 = vld [vmem:[%s1467_s14] sm:$0xff] }
 0x3af   : > { %v2530_v15 = vpop.eup %2529  ;;  %v1366_v17 = vmul.f32 %v2528_v14, %v918_v9  ;;  %v1472_v14 = vunpack.c.l.bf16 %v1468_v11 }
 0x3b0   : > { %v2532_v18 = vpop.eup %2531  ;;  %2290 = vmatpush3.bf16.msra.mxu1 %v1376_v34  ;;  %v1364_v20 = vmul.f32 %v2530_v15, %v916_v13  ;;  %v2486_v34 = vld [vmem:[#allocation14 + $0x50] ss:$12 sps:$4 sm:$0xff]  }
 0x3b1   : > { %v2534_v21 = vpop.eup %2533  ;;  %v1325_v22 = vadd.f32 1.0, %v2532_v18  ;;  %2291 = vmatprep.subr.bf16.mxu1 %v2848_v2  ;;  %v1378_v24 = vpack.c.bf16 %v1366_v17, %v1365_v16  ;;  %v1470_v13 = vld [vmem:[%s1467_s14 + $0xc] sm:$0xff] }
 0x3b2   : > { %v2536_v25 = vpop.eup %2535  ;;  %v1323_v26 = vadd.f32 1.0, %v2534_v21  ;;  %v1377_v27 = vpack.c.bf16 %v1364_v20, %v1363_v19  ;;  %v1475_v15 = vunpack.c.l.bf16 %v1470_v13  ;;  %v1476_v19 = vunpack.c.h.bf16 %v1470_v13 }
 0x3b3   : > { %v2538_v28 = vpop.eup %2537  ;;  %2547 = vrcp.f32 %v1325_v22  ;;  %v1326_v29 = vadd.f32 1.0, %v2536_v25  ;;  %v1469_v22 = vld [vmem:[%s1467_s14 + $0x8] ss:$12 sps:$4 sm:$0xff]  }
 0x3b4   : > { %2549 = vrcp.f32 %v1323_v26  ;;  %v1324_v32 = vadd.f32 1.0, %v2538_v28  ;;  %2292 = vmatpush3.bf16.msra.mxu1 %v1377_v27  ;;  %v1474_v28 = vunpack.c.l.bf16 %v1469_v22 }
 0x3b5   : > { %v2540_v33 = vpop.eup %2539  ;;  %2551 = vrcp.f32 %v1326_v29  ;;  %2293 = vmatprep.subr.bf16.mxu1 %v2848_v2 }
 0x3b6   : > { %v2542_v37 = vpop.eup %2541  ;;  %2553 = vrcp.f32 %v1324_v32  ;;  %v1369_v42 = vmul.f32 %v2540_v33, %v921_v35  ;;  %v1477_v32 = vunpack.c.h.bf16 %v1469_v22 }
 0x3b7   : > { %v2544_v40 = vpop.eup %2543  ;;  %v1367_v44 = vmul.f32 %v2542_v37, %v919_v38 }
 0x3b8   : > { %v2546_v41 = vpop.eup %2545  ;;  %2294 = vmatpush3.bf16.msra.mxu1 %v1378_v24  ;;  %v1370_v43 = vmul.f32 %v2544_v40, %v922_v36 }
 0x3b9   : > { %2295 = vmatprep.subr.bf16.mxu1 %v2848_v2  ;;  %v1368_v45 = vmul.f32 %v2546_v41, %v920_v39 }
 0x3ba   : > { %v1380_v46 = vpack.c.bf16 %v1370_v43, %v1369_v42 }
 0x3bb   : > { %v1379_v47 = vpack.c.bf16 %v1368_v45, %v1367_v44 }
 0x3bd   : > { %v2548_v48 = vpop.eup %2547  ;;  %2296 = vmatpush3.bf16.msra.mxu1 %v1379_v47 }
 0x3be   : > { %v2550_v51 = vpop.eup %2549  ;;  %2297 = vmatprep.subr.bf16.mxu1 %v2848_v2  ;;  %v1373_v10 = vmul.f32 %v2548_v48, %v925_v49 }
 0x3bf   : > { %v2552_v54 = vpop.eup %2551  ;;  %v1371_v57 = vmul.f32 %v2550_v51, %v923_v52 }
 0x3c0   : > { %v2554_v55 = vpop.eup %2553  ;;  %v1374_v56 = vmul.f32 %v2552_v54, %v926_v50 }
 0x3c1   : > { %2298 = vmatpush3.bf16.msra.mxu1 %v1380_v46  ;;  %v1372_v58 = vmul.f32 %v2554_v55, %v924_v53 }
 0x3c2   : > { %2299 = vmatprep.subr.bf16.mxu1 %v2848_v2  ;;  %v1382_v59 = vpack.c.bf16 %v1374_v56, %v1373_v10 }
 0x3c3   : > { %v1381_v60 = vpack.c.bf16 %v1372_v58, %v1371_v57 }
 0x3c5   : > { %2300 = vmatpush3.bf16.msra.mxu1 %v1381_v60 }
 0x3c6   : > { %2301 = vmatprep.subr.bf16.mxu1 %v2848_v2 }
 0x3c9   : > { %2302 = vmatpush3.bf16.msra.mxu1 %v1382_v59 }
 0x3ca   : > { %2307 = vmatprep.subr.bf16.mxu1 %v2848_v2 }
 0x3cc   : > { %2304 = vmatmul.mubr.msk.bf16.vlgmr.msra.gmra.mrb[4].mxu1 %vm3317_vm3, %v2851_v31  ;;  %v2489_v31 = vld [vmem:[#allocation14 + $0x98] ss:$12 sps:$4 sm:$0xff]  }
 0x3cd   : > { %2308 = vmatpush3.bf16.msra.mxu1 %v2477_v61  ;;  %2323 = vmatprep.mubr.msk.bf16.mxu1 %vm2850_vm2, %v2848_v2 }
 0x3ce   : > { %2309 = vmatprep.subr.bf16.mxu1 %v2848_v2 }
 0x3d1   : > { %2310 = vmatpush3.bf16.msra.mxu1 %v2481_v62 }
 0x3d2   : > { %2311 = vmatprep.subr.bf16.mxu1 %v2848_v2 }
 0x3d5   : > { %2312 = vmatpush3.bf16.msra.mxu1 %v2485_v1 }
 0x3d6   : > { %2313 = vmatprep.subr.bf16.mxu1 %v2848_v2 }
 0x3d9   : > { %2314 = vmatpush3.bf16.msra.mxu1 %v2486_v34 }
 0x3da   : > { %2315 = vmatprep.subr.bf16.mxu1 %v2848_v2 }
 0x3dd   : > { %2316 = vmatpush3.bf16.msra.mxu1 %v2487_v63 }
 0x3de   : > { %2317 = vmatprep.subr.bf16.mxu1 %v2848_v2 }
 0x3e1   : > { %2318 = vmatpush3.bf16.msra.mxu1 %v2488_v30 }
 0x3e2   : > { %2319 = vmatprep.subr.bf16.mxu1 %v2848_v2 }
 0x3e5   : > { %2320 = vmatpush3.bf16.msra.mxu1 %v2489_v31 }
 0x3e6   : > { %2321 = vmatprep.subr.bf16.mxu1 %v2848_v2 }
 0x3e9   : > { %2322 = vmatpush3.bf16.msra.mxu1 %v2490_v0 }
 0x3ec   : > { %2324 = vmatmul.mubr.bf16.vlgmr.msra.gmra.mrb[8].mxu1 %v3335_v23  ;;  %v1473_v23 = vunpack.c.h.bf16 %v1468_v11 }
 0x40f   : > { %v1673_v3 = vpop.f32.mrb[16].mxu0 }
 0x410   : > { %v1675_v4 = vpop.f32.mrb[17].mxu0  ;;  %v1723_v16 = vadd.f32 %v1673_v3, %v1472_v14 }
 0x411   : > { %v1677_v5 = vpop.f32.mrb[18].mxu0  ;;  %v1724_v20 = vadd.f32 %v1675_v4, %v1473_v23 }
 0x412   : > { %v1679_v6 = vpop.f32.mrb[19].mxu0  ;;  %v1726_v2 = vadd.f32 %v1677_v5, %v1475_v15  ;;  %v2024_v17 = vmul.f32 -1.442695, %v1723_v16 }
 0x413   : > { %v1727_v21 = vadd.f32 %v1679_v6, %v1476_v19  ;;  %v2026_v25 = vmul.f32 -1.442695, %v1724_v20 }
 0x414   : > { %v2025_v18 = vmul.f32 -1.442695, %v1726_v2  ;;  %2555 = vpow2.f32 %v2024_v17 }
 0x415   : > { %v2027_v27 = vmul.f32 -1.442695, %v1727_v21 }
 0x416   : > { %2557 = vpow2.f32 %v2025_v18 }
 0x417   : > { %2559 = vpow2.f32 %v2026_v25 }
 0x418   : > { %2561 = vpow2.f32 %v2027_v27 }
 0x41e   : > { %v2556_v24 = vpop.eup %2555 }
 0x41f   : > { %v1735_v29 = vadd.f32 1.0, %v2556_v24 }
 0x420   : > { %v2558_v26 = vpop.eup %2557 }
 0x421   : > { %v1736_v33 = vadd.f32 1.0, %v2558_v26  ;;  %2563 = vrcp.f32 %v1735_v29  ;;  %v2560_v41 = vpop.eup %2559 }
 0x422   : > { %v2562_v42 = vpop.eup %2561  ;;  %v1747_v45 = vadd.f32 1.0, %v2560_v41 }
 0x423   : > { %v1748_v49 = vadd.f32 1.0, %v2562_v42 }
 0x42b   : > { %v2564_v43 = vpop.eup %2563 }
 0x49f   : > { %v1458_v7 = vpop.f32.mrb[4].mxu1 }
 0x4a0   : > { %v2305_v8 = vpop.f32.mrb[5].mxu1 }
 0x4a1   : > { %v1461_v9 = vpop.f32.mrb[6].mxu1 }
 0x4a2   : > { %v2306_v12 = vpop.f32.mrb[7].mxu1 }
 0x4bf   : > { %v1716_v35 = vpop.f32.mrb[8].mxu1 }
 0x4c0   : > { %v1725_v36 = vadd.f32 %v1716_v35, %v1474_v28  ;;  %v2325_v37 = vpop.f32.mrb[9].mxu1 }
 0x4c1   : > { %v1719_v38 = vpop.f32.mrb[10].mxu1 }
 0x4c2   : > { %2565 = vtanh.f32 %v1725_v36  ;;  %v1728_v39 = vadd.f32 %v1719_v38, %v1477_v32  ;;  %v2326_v40 = vpop.f32.mrb[11].mxu1 }
 0x4c3   : > { %2567 = vrcp.f32 %v1736_v33 }
 0x4c4   : > { %2569 = vtanh.f32 %v1728_v39 }
 0x4c5   : > { %2571 = vrcp.f32 %v1747_v45 }
 0x4cc   : > { %v2566_v44 = vpop.eup %2565 }
 0x4cd   : > { %v2568_v46 = vpop.eup %2567  ;;  %v1755_v47 = vmul.f32 %v2566_v44, %v2564_v43 }
 0x4ce   : > { %v2570_v48 = vpop.eup %2569 }
 0x4cf   : > { %v1757_v50 = vadd.f32 %v1755_v47, %v1458_v7  ;;  %v1756_v51 = vmul.f32 %v2570_v48, %v2568_v46 }
 0x4d1   : > { %2573 = vtanh.f32 %v1757_v50  ;;  %v1758_v52 = vadd.f32 %v1756_v51, %v1461_v9  ;;  %1767 = vst [vmem:[%s1766_s20] sm:$0xff] %v1757_v50 }
 0x4d2   : > { %2575 = vrcp.f32 %v1748_v49 }
 0x4d3   : > { %2577 = vtanh.f32 %v1758_v52  ;;  %v1775_v53 = vpack.c.bf16 %v1758_v52, %v1757_v50  ;;  %1768 = vst [vmem:[%s1766_s20 + $0x8] sm:$0xff] %v1758_v52 }
 0x4d4   : > { %2744 = shalt.err (!%p2741_p0)
}
 0x4d5   : > { %s2745_s10 = scalar_lea.hbm %s3439_s7, 4096 }
 0x4d6   : > { %p2746_p6 = scmp.ne.s32.totalorder %s3439_s7, %s2745_s10  ;;  %p2751_p2 = scmp.lt.u32.totalorder %s2745_s10, %s3439_s7 }
 0x4d8   : > { %p2747_p9 = pnand %p2746_p6, %p2395_p5 }
 0x4da   : > { %p2748_p11 = pneg %p2747_p9 }
 0x4dc   : > { %p2753_p3 = pnand %p2751_p2, %p2748_p11 }
 0x4de   : > { %2756 = shalt.err (!%p2753_p3)
}
 0x4df   : > { %s2854_s15 = smov 128   ;;  %s2855_s18 = smov 8   ;;  %v2572_v54 = vpop.eup %2571 }
 0x4e0   : > { %2364 = dma.vmem_to_hbm [thread:$0]  (%p2395_p5), %s1799_s26, 4096, %s3439_s7, [#allocation19], %s2854_s15, %s2854_s15, %s2855_s18   ;;  %v2574_v55 = vpop.eup %2573 }
 0x4e1   : > { %s1777_s14 = scalar_lea.vmem [#allocation3], %s3362_s19  ;;  %s2856_s25 = smov [#allocation17]   ;;  %v2576_v10 = vpop.eup %2575  ;;  %v1761_v56 = vmul.f32 %v2574_v55, %v2572_v54 }
 0x4e2   : > { %1778 = vst [vmem:[%s1777_s14] sm:$0xff] %v1775_v53  ;;  %s1785_s22 = sshll.u32 %s2856_s25, 4  ;;  %v2578_v57 = vpop.eup %2577  ;;  %s1763_s20 = scalar_lea.vmem [#allocation17], %s3125_s17  ;;  %s1786_s22 = int_to_ptr.vmem [resolvable:$true] %s1785_s22 }
 0x4e3   : > { %v1762_v58 = vmul.f32 %v2578_v57, %v2576_v10  ;;  %1764 = vst [vmem:[%s1763_s20] sm:$0xff] %v1761_v56  ;;  %s2757_s27 = scalar_lea.vmem %s1786_s22, 4096  ;;  %p2764_p13 = scmp.lt.s32.totalorder %s1786_s22, %s1786_s22 }
 0x4e4   : > { %p2758_p10 = scmp.ne.s32.totalorder %s1786_s22, %s2757_s27  ;;  %p2765_p1 = scmp.lt.s32.totalorder %s2757_s27, %s2757_s27 }
 0x4e5   : > { %1765 = vst [vmem:[%s1763_s20 + $0x8] sm:$0xff] %v1762_v58  ;;  %v1769_v59 = vpack.c.bf16 %v1762_v58, %v1761_v56 }
 0x4e6   : > { %p2759_p8 = pnand %p2758_p10, %p2395_p5  ;;  %p2766_p4 = por %p2765_p1, %p2764_p13 }
 0x4e8   : > { %p2760_p12 = pneg %p2759_p8 }
 0x4ea   : > { %p2767_p7 = pnand %p2766_p4, %p2760_p12 }
 0x4ec   : > { %2770 = shalt.err (!%p2767_p7)
}
 0x4ed   : > { %s2771_s9 = scalar_lea.hbm %s3438_s6, 4096 }
 0x4ee   : > { %p2772_p0 = scmp.ne.s32.totalorder %s3438_s6, %s2771_s9  ;;  %p2777_p11 = scmp.lt.u32.totalorder %s2771_s9, %s3438_s6 }
 0x4f0   : > { %p2773_p6 = pnand %p2772_p0, %p2395_p5 }
 0x4f2   : > { %p2774_p9 = pneg %p2773_p6 }
 0x4f4   : > { %p2779_p2 = pnand %p2777_p11, %p2774_p9 }
 0x4f6   : > { %2782 = shalt.err (!%p2779_p2)
}
 0x4f7   : > { %2362 = dma.vmem_to_hbm [thread:$0]  (%p2395_p5), %s1786_s22, 4096, %s3438_s6, [#allocation10], %s2854_s15, %s2854_s15, %s2855_s18  }
 0x4f8   : > { %s1773_s21 = scalar_lea.vmem [#allocation2], %s3362_s19 }
 0x4f9   : > { %1774 = vst [vmem:[%s1773_s21] sm:$0xff] %v1769_v59 }
 0x4fa   : > { %2814 = dma.done.wait (%p2395_p5), [#allocation10], 4096  }
 0x4fb   : > { %2816 = vsyncadd (%p2395_p5), [#allocation10], 4294963200 }
 0x4fc   : > { %2818 = dma.done.wait (%p2395_p5), [#allocation19], 4096  }
 0x4fd   : > { %2820 = vsyncadd (%p2395_p5), [#allocation19], 4294963200 }
 0x4fe PF: > { %p26_p3 = scmp.ge.s32.totalorder %s3048_s28, 5   ;;  %s3456_s11 = smov %s2827_s12 }
 0x4ff   : > { %s3457_s12 = smov %s2831_s13  ;;  %s3458_s13 = smov %s3060_s29 }
 0x500   : > { %s3459_s14 = smov %s3048_s28  ;;  %28 = sbr.rel (!%p26_p3) target bundleno = 19 (0x13), region = 115 }
 0x507   :  { %1818 = vsyncpa [#allocation9], 1 }
 0x508   :  { %1820 = vsyncpa [#allocation9 + $0x1], 1 }
 0x509   :  { %1821 = vsyncpa [#allocation12], 1 }
 0x50a   :  { %1822 = vsyncpa [#allocation15], 1 }
 0x50b   :  { %1823 = vsyncpa [#allocation10], 1 }
 0x50c   :  { %1825 = vsyncpa [#allocation10 + $0x1], 1 }
 0x50d   :  { %1826 = vsyncpa [#allocation19], 1 }

</bundles_post_ra>
